<compile_context>
chip_gen: v7x
topology: tpu7x:2x2x1
jax: 0.10.0
libtpu: 0.0.40
codegen_flags: <defaults>
</compile_context>

<pallas_src>
import functools

import jax
import jax.numpy as jnp
from jax.experimental import pallas as pl
from jax.experimental.pallas import tpu as pltpu


# ----------------------------------------------------------------------------
# Kernel A: fused channel / gating pre-pass, (C, H*W) slab layout
# ----------------------------------------------------------------------------
def _pre_kernel(x_ref, wcc_ref, bcc_ref, band_ref,
                ghk_ref, gctx_ref, fastn_ref, mixn_ref, hcin_ref,
                lk1_ref, lk2_ref, lk3_ref, lk4_ref):
    f32 = jnp.float32
    x = x_ref[0].astype(f32)                              # (C, HW)

    def cmix(k, v):
        # 1x1 conv / LinearNd: (Cout, Cin) @ (Cin, HW) + (Cout, 1)
        # (lane-dense slab layout; the C=4 contraction is negligible either way)
        return (jnp.dot(wcc_ref[k].astype(f32), v,
                        preferred_element_type=f32) + bcc_ref[k].astype(f32))

    def inorm(v):
        # InstanceNorm2d(affine=False), normalize each channel over H*W (lanes)
        m = jnp.mean(v, axis=-1, keepdims=True)
        var = jnp.mean((v - m) * (v - m), axis=-1, keepdims=True)
        return (v - m) * jax.lax.rsqrt(var + 1e-5)

    # TODO(synk): SlowNet_G internals unspecified; approximated as a
    # sigmoid-gated 1x1 channel mixer.
    ghk = jax.nn.sigmoid(cmix(0, x))
    gctx = x * ghk                                        # global_ctx_hk

    # fast = RGU_2(global_ctx_hk) + RGU(x)
    # TODO(synk): RGU internals unspecified; approximated as tanh/sigmoid gated
    # channel mixers.
    fast = (jnp.tanh(cmix(1, gctx)) * jax.nn.sigmoid(cmix(2, gctx)) +
            jnp.tanh(cmix(3, x)) * jax.nn.sigmoid(cmix(4, x)))

    # channel_mixer_mlp (Linear2d)
    mixer = cmix(5, x)

    # TODO(synk): HyperChannelInteract approximated as squeeze over H*W, banded
    # 1D conv across channels, sigmoid gate, rescale.
    pooled = jnp.mean(x, axis=-1, keepdims=True)          # (C, 1)
    gate = jax.nn.sigmoid(jnp.sum(band_ref[...].astype(f32) * pooled.T,
                                  axis=-1, keepdims=True))
    hci = x * gate

    fast_n = inorm(fast)
    mix_n = inorm(mixer)
    hci_n = inorm(hci)

    dt = ghk_ref.dtype
    ghk_ref[0] = ghk.astype(dt)
    gctx_ref[0] = gctx.astype(dt)
    fastn_ref[0] = fast_n.astype(dt)
    mixn_ref[0] = mix_n.astype(dt)
    hcin_ref[0] = hci_n.astype(dt)
    # TODO(synk): SlowNet_L1..L4 internals unspecified; approximated as 1x1
    # channel mixers feeding the LocalConv gating in the post-pass.
    lk1_ref[0] = cmix(6, x).astype(dt)
    lk2_ref[0] = cmix(7, hci_n).astype(dt)
    lk3_ref[0] = cmix(8, mix_n).astype(dt)
    lk4_ref[0] = cmix(9, x).astype(dt)


# ----------------------------------------------------------------------------
# Kernel B: batched per-channel (H,W)@(H,W) spatial matmuls, (C*H, W) layout
# ----------------------------------------------------------------------------
def _spatial_kernel(g_ref, f_ref, m_ref, h_ref, o_ref, ox_ref, oh_ref, *, C, H):
    f32 = jnp.float32
    g = g_ref[0].astype(f32)                              # (C*H, W)
    f = f_ref[0].astype(f32)
    m = m_ref[0].astype(f32)
    h = h_ref[0].astype(f32)
    o_l, ox_l, oh_l = [], [], []
    for c in range(C):                                    # C matmuls per step
        sl = slice(c * H, (c + 1) * H)
        gc = g[sl, :]
        o_l.append(jnp.dot(gc, f[sl, :], preferred_element_type=f32))
        ox_l.append(jnp.dot(gc, m[sl, :], preferred_element_type=f32))
        oh_l.append(jnp.dot(gc, h[sl, :], preferred_element_type=f32))
    o_ref[0] = jnp.concatenate(o_l, axis=0).astype(o_ref.dtype)
    ox_ref[0] = jnp.concatenate(ox_l, axis=0).astype(ox_ref.dtype)
    oh_ref[0] = jnp.concatenate(oh_l, axis=0).astype(oh_ref.dtype)


# ----------------------------------------------------------------------------
# Kernel C: GLU + HyperInteract + LocalConv gating + fused bottleneck
# ----------------------------------------------------------------------------
def _post_kernel(x_ref, out_ref, outx_ref, outh_ref, fastn_ref, mixn_ref,
                 hcin_ref, lk1_ref, lk2_ref, lk3_ref, lk4_ref,
                 bandhi_ref, wbot_ref, bbot_ref, lbias_ref, outo_ref):
    f32 = jnp.float32
    x = x_ref[0].astype(f32)
    out = out_ref[0].astype(f32)
    out_x = outx_ref[0].astype(f32)
    out_hci = outh_ref[0].astype(f32)
    fast_n = fastn_ref[0].astype(f32)
    mix_n = mixn_ref[0].astype(f32)
    hci_n = hcin_ref[0].astype(f32)
    lk1 = lk1_ref[0].astype(f32)
    lk2 = lk2_ref[0].astype(f32)
    lk3 = lk3_ref[0].astype(f32)
    lk4 = lk4_ref[0].astype(f32)
    lb = lbias_ref[...].astype(f32)                       # (4, 1)

    # reference: self.nonlinear = Sigmoid(); out_glu = sigmoid(out) * out
    out_glu = jax.nn.sigmoid(out) * out

    # TODO(synk): HyperInteract approximated as channel gate (banded conv over
    # channel means of `out`) x spatial gate (channel-mean of `out`), on x.
    pooled_o = jnp.mean(out, axis=-1, keepdims=True)      # (C, 1)
    gate_c = jax.nn.sigmoid(jnp.sum(bandhi_ref[...].astype(f32) * pooled_o.T,
                                    axis=-1, keepdims=True))
    gate_s = jax.nn.sigmoid(jnp.mean(out, axis=0, keepdims=True))  # (1, HW)
    x_hyper = x * gate_c * gate_s

    # TODO(synk): LocalConv's dynamically generated depthwise conv approximated
    # by elementwise gating (kernel_feature * input) + scalar bias.
    lf1 = lk1 * hci_n + lb[0:1]
    lf2 = lk2 * x + lb[1:2]
    lf3 = lk3 * x + lb[2:3]
    lf4 = lk4 * mix_n + lb[3:4]

    # bottleneck 1x1 conv over the 10-way channel concat, accumulated in-kernel
    # (w_bottle pre-split into per-branch (C_out*bf, C) slices).
    branches = (out, lf2, fast_n, out_x, lf1, out_glu, lf3, out_hci, lf4,
                x_hyper)
    acc = bbot_ref[...].astype(f32) + jnp.dot(
        wbot_ref[0].astype(f32), branches[0], preferred_element_type=f32)
    for k in range(1, len(branches)):
        acc = acc + jnp.dot(wbot_ref[k].astype(f32), branches[k],
                            preferred_element_type=f32)
    outo_ref[0] = acc.astype(outo_ref.dtype)


# ----------------------------------------------------------------------------
# wrapper
# ----------------------------------------------------------------------------
def _full_spec(a):
    n = a.ndim
    return pl.BlockSpec(a.shape, lambda b, n=n: (0,) * n)


def fast_multi_branch_forward(params, x):
    # TODO(synk): x_pre / x_pre_pre concat branches are not implemented
    # (num_concat_pre=0, default call path only).
    B, C, H, W = x.shape
    HW = H * W
    Cbf = params["wbot_stack"].shape[1]
    # reference torch.matmul broadcast requires out_channels == in_channels
    assert params["w_cc"].shape[1] == C and params["w_cc"].shape[2] == C

    parallel = pltpu.CompilerParams(dimension_semantics=("parallel",))
    slab = lambda: pl.BlockSpec((1, C, HW), lambda b: (b, 0, 0))
    tall = lambda: pl.BlockSpec((1, C * H, W), lambda b: (b, 0, 0))

    x_s = x.reshape(B, C, HW)

    # ---- kernel A: fused channel / gating pre-pass -------------------------
    (ghk_s, gctx_s, fastn_s, mixn_s, hcin_s,
     lk1_s, lk2_s, lk3_s, lk4_s) = pl.pallas_call(
        _pre_kernel,
        grid=(B,),
        in_specs=[slab(), _full_spec(params["w_cc"]),
                  _full_spec(params["b_cc"]), _full_spec(params["band_gc"])],
        out_specs=[slab() for _ in range(9)],
        out_shape=[jax.ShapeDtypeStruct((B, C, HW), x.dtype)] * 9,
        compiler_params=parallel,
    )(x_s, params["w_cc"], params["b_cc"], params["band_gc"])

    # ---- kernel B: batched spatial matmuls ---------------------------------
    to_tall = lambda v: v.reshape(B, C * H, W)            # free reshape
    out_t, outx_t, outh_t = pl.pallas_call(
        functools.partial(_spatial_kernel, C=C, H=H),
        grid=(B,),
        in_specs=[tall() for _ in range(4)],
        out_specs=[tall() for _ in range(3)],
        out_shape=[jax.ShapeDtypeStruct((B, C * H, W), x.dtype)] * 3,
        compiler_params=parallel,
    )(to_tall(gctx_s), to_tall(fastn_s), to_tall(mixn_s), to_tall(hcin_s))

    # ---- kernel C: post-pass + fused bottleneck ----------------------------
    to_slab = lambda v: v.reshape(B, C, HW)               # free reshape
    out_o_s = pl.pallas_call(
        _post_kernel,
        grid=(B,),
        in_specs=([slab() for _ in range(11)]
                  + [_full_spec(params["band_hi"]),
                     _full_spec(params["wbot_stack"]),
                     _full_spec(params["b_bot"]),
                     _full_spec(params["lbias"])]),
        out_specs=pl.BlockSpec((1, Cbf, HW), lambda b: (b, 0, 0)),
        out_shape=jax.ShapeDtypeStruct((B, Cbf, HW), x.dtype),
        compiler_params=parallel,
    )(x_s, to_slab(out_t), to_slab(outx_t), to_slab(outh_t),
      fastn_s, mixn_s, hcin_s, lk1_s, lk2_s, lk3_s, lk4_s,
      params["band_hi"], params["wbot_stack"], params["b_bot"],
      params["lbias"])

    out_o = out_o_s.reshape(B, Cbf, H, W)
    global_hk = ghk_s.reshape(B, C, H, W)
    return out_o, global_hk


# ----------------------------------------------------------------------------
# parameters (deterministic, in-script)
# ----------------------------------------------------------------------------
def make_band(key, C, k):
    # banded Toeplitz matrix == 1D conv of width k across the channel axis
    w = jax.random.normal(key, (k,), jnp.float32) * (1.0 / k)
    half = k // 2
    i = jnp.arange(C)[:, None]
    j = jnp.arange(C)[None, :]
    d = j - i + half
    mask = (d >= 0) & (d < k)
    return jnp.where(mask, w[jnp.clip(d, 0, k - 1)], 0.0)


def init_params(key, C, C_out, num_concat=10, bottleneck_factor=2,
                k_gc=3, k_hi=3):
    assert C_out == C, "reference torch.matmul requires out_channels == in_channels"
    keys = jax.random.split(key, 16)

    def lin_t(k, cin, cout, std=None):
        s = std if std is not None else (1.0 / float(cin) ** 0.5)
        # pre-transposed (Cout, Cin) so kernels compute W^T @ slab directly
        return (jax.random.normal(k, (cin, cout), jnp.float32) * s).T

    w_list = [
        lin_t(keys[0], C, C),                               # slow_net_g
        lin_t(keys[1], C, C), lin_t(keys[2], C, C),         # RGU_2 (h, g)
        lin_t(keys[3], C, C), lin_t(keys[4], C, C),         # RGU   (h, g)
        lin_t(keys[5], C, C_out, std=(2.0 / C) ** 0.5),     # channel_mixer_mlp
        lin_t(keys[6], C, C), lin_t(keys[7], C, C),         # slow_net_l1, l2
        lin_t(keys[8], C, C), lin_t(keys[9], C, C),         # slow_net_l3, l4
    ]
    p = {
        "w_cc": jnp.stack(w_list, axis=0),                  # (10, C, C)
        "b_cc": jnp.zeros((10, C, 1), jnp.float32),         # zero biases
        "band_gc": make_band(keys[10], C, k_gc),            # (C, C)
        "band_hi": make_band(keys[11], C, k_hi),            # (C, C)
        "lbias": jnp.zeros((4, 1), jnp.float32),            # bias1..bias4
        "b_bot": jnp.zeros((C_out * bottleneck_factor, 1), jnp.float32),
    }
    # bottleneck (kaiming), pre-transposed and split into per-branch slices
    w_bot = jax.random.normal(
        keys[12], (C * num_concat, C_out * bottleneck_factor),
        jnp.float32) * (2.0 / (C * num_concat)) ** 0.5
    w_bot_t = w_bot.T                                       # (Cbf, 10*C)
    p["wbot_stack"] = jnp.stack(
        [w_bot_t[:, k * C:(k + 1) * C] for k in range(num_concat)],
        axis=0)                                             # (10, Cbf, C)
    return p


# ----------------------------------------------------------------------------
if __name__ == "__main__":
    B, C, H, W = 2, 4, 16, 16      # in_channels = 4
    C_out = 4                      # out_channels == in_channels (required by
                                   # torch.matmul broadcast in the reference)
    bottleneck_factor = 2

    key = jax.random.PRNGKey(0)
    kx, kp = jax.random.split(key)
    x = jax.random.normal(kx, (B, C, H, W), jnp.float32)
    params = init_params(kp, C, C_out, num_concat=10,
                         bottleneck_factor=bottleneck_factor)

    fwd = jax.jit(fast_multi_branch_forward)
    out_o, global_hk = fwd(params, x)
    jax.block_until_ready((out_o, global_hk))

    assert out_o.shape == (B, C_out * bottleneck_factor, H, W)
    assert global_hk.shape == (B, C, H, W)
    assert bool(jnp.all(jnp.isfinite(out_o)))
    assert bool(jnp.all(jnp.isfinite(global_hk)))
    print("KERNEL_OK")
</pallas_src>

<mosaic_0001>
module attributes {stable_mosaic.version = 11 : i64} {
  func.func @_pre_kernel(%arg0: i32, %arg1: memref<1x4x256xf32, #tpu.memory_space<vmem>>, %arg2: memref<10x4x4xf32, #tpu.memory_space<vmem>>, %arg3: memref<10x4x1xf32, #tpu.memory_space<vmem>>, %arg4: memref<4x4xf32, #tpu.memory_space<vmem>>, %arg5: memref<1x4x256xf32, #tpu.memory_space<vmem>>, %arg6: memref<1x4x256xf32, #tpu.memory_space<vmem>>, %arg7: memref<1x4x256xf32, #tpu.memory_space<vmem>>, %arg8: memref<1x4x256xf32, #tpu.memory_space<vmem>>, %arg9: memref<1x4x256xf32, #tpu.memory_space<vmem>>, %arg10: memref<1x4x256xf32, #tpu.memory_space<vmem>>, %arg11: memref<1x4x256xf32, #tpu.memory_space<vmem>>, %arg12: memref<1x4x256xf32, #tpu.memory_space<vmem>>, %arg13: memref<1x4x256xf32, #tpu.memory_space<vmem>>) attributes {dimension_semantics = [#tpu.dimension_semantics<parallel>], iteration_bounds = array<i64: 2>, scalar_prefetch = 0 : i64, scratch_operands = 0 : i64, tpu.core_type = #tpu.core_type<tc>, window_params = [{transform_indices = @transform_0, window_bounds = array<i64: 1, 4, 256>}, {pipeline_mode = #tpu.pipeline_mode<synchronous>, transform_indices = @transform_1, window_bounds = array<i64: 10, 4, 4>}, {pipeline_mode = #tpu.pipeline_mode<synchronous>, transform_indices = @transform_2, window_bounds = array<i64: 10, 4, 1>}, {pipeline_mode = #tpu.pipeline_mode<synchronous>, transform_indices = @transform_3, window_bounds = array<i64: 4, 4>}, {transform_indices = @transform_4, window_bounds = array<i64: 1, 4, 256>}, {transform_indices = @transform_5, window_bounds = array<i64: 1, 4, 256>}, {transform_indices = @transform_6, window_bounds = array<i64: 1, 4, 256>}, {transform_indices = @transform_7, window_bounds = array<i64: 1, 4, 256>}, {transform_indices = @transform_8, window_bounds = array<i64: 1, 4, 256>}, {transform_indices = @transform_9, window_bounds = array<i64: 1, 4, 256>}, {transform_indices = @transform_10, window_bounds = array<i64: 1, 4, 256>}, {transform_indices = @transform_11, window_bounds = array<i64: 1, 4, 256>}, {transform_indices = @transform_12, window_bounds = array<i64: 1, 4, 256>}]} {
    %c0 = arith.constant 0 : index
    %c0_0 = arith.constant 0 : index
    %c0_1 = arith.constant 0 : index
    %0 = vector.load %arg1[%c0, %c0_0, %c0_1] : memref<1x4x256xf32, #tpu.memory_space<vmem>>, vector<1x4x256xf32>
    %1 = vector.shape_cast %0 : vector<1x4x256xf32> to vector<4x256xf32>
    %c0_2 = arith.constant 0 : index
    %c0_3 = arith.constant 0 : index
    %c0_4 = arith.constant 0 : index
    %2 = vector.load %arg2[%c0_2, %c0_3, %c0_4] : memref<10x4x4xf32, #tpu.memory_space<vmem>>, vector<1x4x4xf32>
    %3 = vector.shape_cast %2 : vector<1x4x4xf32> to vector<4x4xf32>
    %cst = arith.constant dense<0.000000e+00> : vector<4x256xf32>
    %4 = tpu.matmul %3, %1, %cst {dimension_numbers = #tpu.dot_dimension_numbers<[1], [0], [0], [1], [0, 0, 1, 1], [], []>} : vector<4x4xf32>, vector<4x256xf32>, vector<4x256xf32> -> vector<4x256xf32>
    %c0_5 = arith.constant 0 : index
    %c0_6 = arith.constant 0 : index
    %c0_7 = arith.constant 0 : index
    %5 = vector.load %arg3[%c0_5, %c0_6, %c0_7] : memref<10x4x1xf32, #tpu.memory_space<vmem>>, vector<1x4x1xf32>
    %6 = vector.shape_cast %5 : vector<1x4x1xf32> to vector<4x1xf32>
    %7 = vector.broadcast %6 : vector<4x1xf32> to vector<4x256xf32>
    %8 = arith.addf %4, %7 : vector<4x256xf32>
    %9 = arith.negf %8 : vector<4x256xf32>
    %10 = math.exp %9 : vector<4x256xf32>
    %cst_8 = arith.constant 1.000000e+00 : f32
    %11 = vector.broadcast %cst_8 : f32 to vector<4x256xf32>
    %12 = arith.addf %11, %10 : vector<4x256xf32>
    %13 = arith.divf %11, %12 : vector<4x256xf32>
    %14 = arith.mulf %1, %13 : vector<4x256xf32>
    %c1 = arith.constant 1 : index
    %c0_9 = arith.constant 0 : index
    %c0_10 = arith.constant 0 : index
    %15 = vector.load %arg2[%c1, %c0_9, %c0_10] : memref<10x4x4xf32, #tpu.memory_space<vmem>>, vector<1x4x4xf32>
    %16 = vector.shape_cast %15 : vector<1x4x4xf32> to vector<4x4xf32>
    %cst_11 = arith.constant dense<0.000000e+00> : vector<4x256xf32>
    %17 = tpu.matmul %16, %14, %cst_11 {dimension_numbers = #tpu.dot_dimension_numbers<[1], [0], [0], [1], [0, 0, 1, 1], [], []>} : vector<4x4xf32>, vector<4x256xf32>, vector<4x256xf32> -> vector<4x256xf32>
    %c1_12 = arith.constant 1 : index
    %c0_13 = arith.constant 0 : index
    %c0_14 = arith.constant 0 : index
    %18 = vector.load %arg3[%c1_12, %c0_13, %c0_14] : memref<10x4x1xf32, #tpu.memory_space<vmem>>, vector<1x4x1xf32>
    %19 = vector.shape_cast %18 : vector<1x4x1xf32> to vector<4x1xf32>
    %20 = vector.broadcast %19 : vector<4x1xf32> to vector<4x256xf32>
    %21 = arith.addf %17, %20 : vector<4x256xf32>
    %22 = math.tanh %21 : vector<4x256xf32>
    %c2 = arith.constant 2 : index
    %c0_15 = arith.constant 0 : index
    %c0_16 = arith.constant 0 : index
    %23 = vector.load %arg2[%c2, %c0_15, %c0_16] : memref<10x4x4xf32, #tpu.memory_space<vmem>>, vector<1x4x4xf32>
    %24 = vector.shape_cast %23 : vector<1x4x4xf32> to vector<4x4xf32>
    %cst_17 = arith.constant dense<0.000000e+00> : vector<4x256xf32>
    %25 = tpu.matmul %24, %14, %cst_17 {dimension_numbers = #tpu.dot_dimension_numbers<[1], [0], [0], [1], [0, 0, 1, 1], [], []>} : vector<4x4xf32>, vector<4x256xf32>, vector<4x256xf32> -> vector<4x256xf32>
    %c2_18 = arith.constant 2 : index
    %c0_19 = arith.constant 0 : index
    %c0_20 = arith.constant 0 : index
    %26 = vector.load %arg3[%c2_18, %c0_19, %c0_20] : memref<10x4x1xf32, #tpu.memory_space<vmem>>, vector<1x4x1xf32>
    %27 = vector.shape_cast %26 : vector<1x4x1xf32> to vector<4x1xf32>
    %28 = vector.broadcast %27 : vector<4x1xf32> to vector<4x256xf32>
    %29 = arith.addf %25, %28 : vector<4x256xf32>
    %30 = arith.negf %29 : vector<4x256xf32>
    %31 = math.exp %30 : vector<4x256xf32>
    %cst_21 = arith.constant 1.000000e+00 : f32
    %32 = vector.broadcast %cst_21 : f32 to vector<4x256xf32>
    %33 = arith.addf %32, %31 : vector<4x256xf32>
    %34 = arith.divf %32, %33 : vector<4x256xf32>
    %35 = arith.mulf %22, %34 : vector<4x256xf32>
    %c3 = arith.constant 3 : index
    %c0_22 = arith.constant 0 : index
    %c0_23 = arith.constant 0 : index
    %36 = vector.load %arg2[%c3, %c0_22, %c0_23] : memref<10x4x4xf32, #tpu.memory_space<vmem>>, vector<1x4x4xf32>
    %37 = vector.shape_cast %36 : vector<1x4x4xf32> to vector<4x4xf32>
    %cst_24 = arith.constant dense<0.000000e+00> : vector<4x256xf32>
    %38 = tpu.matmul %37, %1, %cst_24 {dimension_numbers = #tpu.dot_dimension_numbers<[1], [0], [0], [1], [0, 0, 1, 1], [], []>} : vector<4x4xf32>, vector<4x256xf32>, vector<4x256xf32> -> vector<4x256xf32>
    %c3_25 = arith.constant 3 : index
    %c0_26 = arith.constant 0 : index
    %c0_27 = arith.constant 0 : index
    %39 = vector.load %arg3[%c3_25, %c0_26, %c0_27] : memref<10x4x1xf32, #tpu.memory_space<vmem>>, vector<1x4x1xf32>
    %40 = vector.shape_cast %39 : vector<1x4x1xf32> to vector<4x1xf32>
    %41 = vector.broadcast %40 : vector<4x1xf32> to vector<4x256xf32>
    %42 = arith.addf %38, %41 : vector<4x256xf32>
    %43 = math.tanh %42 : vector<4x256xf32>
    %c4 = arith.constant 4 : index
    %c0_28 = arith.constant 0 : index
    %c0_29 = arith.constant 0 : index
    %44 = vector.load %arg2[%c4, %c0_28, %c0_29] : memref<10x4x4xf32, #tpu.memory_space<vmem>>, vector<1x4x4xf32>
    %45 = vector.shape_cast %44 : vector<1x4x4xf32> to vector<4x4xf32>
    %cst_30 = arith.constant dense<0.000000e+00> : vector<4x256xf32>
    %46 = tpu.matmul %45, %1, %cst_30 {dimension_numbers = #tpu.dot_dimension_numbers<[1], [0], [0], [1], [0, 0, 1, 1], [], []>} : vector<4x4xf32>, vector<4x256xf32>, vector<4x256xf32> -> vector<4x256xf32>
    %c4_31 = arith.constant 4 : index
    %c0_32 = arith.constant 0 : index
    %c0_33 = arith.constant 0 : index
    %47 = vector.load %arg3[%c4_31, %c0_32, %c0_33] : memref<10x4x1xf32, #tpu.memory_space<vmem>>, vector<1x4x1xf32>
    %48 = vector.shape_cast %47 : vector<1x4x1xf32> to vector<4x1xf32>
    %49 = vector.broadcast %48 : vector<4x1xf32> to vector<4x256xf32>
    %50 = arith.addf %46, %49 : vector<4x256xf32>
    %51 = arith.negf %50 : vector<4x256xf32>
    %52 = math.exp %51 : vector<4x256xf32>
    %cst_34 = arith.constant 1.000000e+00 : f32
    %53 = vector.broadcast %cst_34 : f32 to vector<4x256xf32>
    %54 = arith.addf %53, %52 : vector<4x256xf32>
    %55 = arith.divf %53, %54 : vector<4x256xf32>
    %56 = arith.mulf %43, %55 : vector<4x256xf32>
    %57 = arith.addf %35, %56 : vector<4x256xf32>
    %c5 = arith.constant 5 : index
    %c0_35 = arith.constant 0 : index
    %c0_36 = arith.constant 0 : index
    %58 = vector.load %arg2[%c5, %c0_35, %c0_36] : memref<10x4x4xf32, #tpu.memory_space<vmem>>, vector<1x4x4xf32>
    %59 = vector.shape_cast %58 : vector<1x4x4xf32> to vector<4x4xf32>
    %cst_37 = arith.constant dense<0.000000e+00> : vector<4x256xf32>
    %60 = tpu.matmul %59, %1, %cst_37 {dimension_numbers = #tpu.dot_dimension_numbers<[1], [0], [0], [1], [0, 0, 1, 1], [], []>} : vector<4x4xf32>, vector<4x256xf32>, vector<4x256xf32> -> vector<4x256xf32>
    %c5_38 = arith.constant 5 : index
    %c0_39 = arith.constant 0 : index
    %c0_40 = arith.constant 0 : index
    %61 = vector.load %arg3[%c5_38, %c0_39, %c0_40] : memref<10x4x1xf32, #tpu.memory_space<vmem>>, vector<1x4x1xf32>
    %62 = vector.shape_cast %61 : vector<1x4x1xf32> to vector<4x1xf32>
    %63 = vector.broadcast %62 : vector<4x1xf32> to vector<4x256xf32>
    %64 = arith.addf %60, %63 : vector<4x256xf32>
    %cst_41 = arith.constant dense<0.000000e+00> : vector<4xf32>
    %65 = vector.multi_reduction <add>, %1, %cst_41 [1] : vector<4x256xf32> to vector<4xf32>
    %66 = vector.shape_cast %65 : vector<4xf32> to vector<4x1xf32>
    %cst_42 = arith.constant 2.560000e+02 : f32
    %67 = vector.broadcast %cst_42 : f32 to vector<4x1xf32>
    %68 = arith.divf %66, %67 : vector<4x1xf32>
    %c0_43 = arith.constant 0 : index
    %c0_44 = arith.constant 0 : index
    %69 = vector.load %arg4[%c0_43, %c0_44] : memref<4x4xf32, #tpu.memory_space<vmem>>, vector<4x4xf32>
    %70 = tpu.transpose %68, [1, 0] : vector<4x1xf32> -> vector<1x4xf32>
    %71 = vector.broadcast %70 : vector<1x4xf32> to vector<4x4xf32>
    %72 = arith.mulf %69, %71 : vector<4x4xf32>
    %cst_45 = arith.constant dense<0.000000e+00> : vector<4xf32>
    %73 = vector.multi_reduction <add>, %72, %cst_45 [1] : vector<4x4xf32> to vector<4xf32>
    %74 = vector.shape_cast %73 : vector<4xf32> to vector<4x1xf32>
    %75 = arith.negf %74 : vector<4x1xf32>
    %76 = math.exp %75 : vector<4x1xf32>
    %cst_46 = arith.constant 1.000000e+00 : f32
    %77 = vector.broadcast %cst_46 : f32 to vector<4x1xf32>
    %78 = arith.addf %77, %76 : vector<4x1xf32>
    %79 = arith.divf %77, %78 : vector<4x1xf32>
    %80 = vector.broadcast %79 : vector<4x1xf32> to vector<4x256xf32>
    %81 = arith.mulf %1, %80 : vector<4x256xf32>
    %cst_47 = arith.constant dense<0.000000e+00> : vector<4xf32>
    %82 = vector.multi_reduction <add>, %57, %cst_47 [1] : vector<4x256xf32> to vector<4xf32>
    %83 = vector.shape_cast %82 : vector<4xf32> to vector<4x1xf32>
    %cst_48 = arith.constant 2.560000e+02 : f32
    %84 = vector.broadcast %cst_48 : f32 to vector<4x1xf32>
    %85 = arith.divf %83, %84 : vector<4x1xf32>
    %86 = vector.broadcast %85 : vector<4x1xf32> to vector<4x256xf32>
    %87 = arith.subf %57, %86 : vector<4x256xf32>
    %88 = vector.broadcast %85 : vector<4x1xf32> to vector<4x256xf32>
    %89 = arith.subf %57, %88 : vector<4x256xf32>
    %90 = arith.mulf %87, %89 : vector<4x256xf32>
    %cst_49 = arith.constant dense<0.000000e+00> : vector<4xf32>
    %91 = vector.multi_reduction <add>, %90, %cst_49 [1] : vector<4x256xf32> to vector<4xf32>
    %92 = vector.shape_cast %91 : vector<4xf32> to vector<4x1xf32>
    %cst_50 = arith.constant 2.560000e+02 : f32
    %93 = vector.broadcast %cst_50 : f32 to vector<4x1xf32>
    %94 = arith.divf %92, %93 : vector<4x1xf32>
    %95 = vector.broadcast %85 : vector<4x1xf32> to vector<4x256xf32>
    %96 = arith.subf %57, %95 : vector<4x256xf32>
    %cst_51 = arith.constant 9.99999974E-6 : f32
    %97 = vector.broadcast %cst_51 : f32 to vector<4x1xf32>
    %98 = arith.addf %94, %97 : vector<4x1xf32>
    %99 = math.rsqrt %98 : vector<4x1xf32>
    %100 = vector.broadcast %99 : vector<4x1xf32> to vector<4x256xf32>
    %101 = arith.mulf %96, %100 : vector<4x256xf32>
    %cst_52 = arith.constant dense<0.000000e+00> : vector<4xf32>
    %102 = vector.multi_reduction <add>, %64, %cst_52 [1] : vector<4x256xf32> to vector<4xf32>
    %103 = vector.shape_cast %102 : vector<4xf32> to vector<4x1xf32>
    %cst_53 = arith.constant 2.560000e+02 : f32
    %104 = vector.broadcast %cst_53 : f32 to vector<4x1xf32>
    %105 = arith.divf %103, %104 : vector<4x1xf32>
    %106 = vector.broadcast %105 : vector<4x1xf32> to vector<4x256xf32>
    %107 = arith.subf %64, %106 : vector<4x256xf32>
    %108 = vector.broadcast %105 : vector<4x1xf32> to vector<4x256xf32>
    %109 = arith.subf %64, %108 : vector<4x256xf32>
    %110 = arith.mulf %107, %109 : vector<4x256xf32>
    %cst_54 = arith.constant dense<0.000000e+00> : vector<4xf32>
    %111 = vector.multi_reduction <add>, %110, %cst_54 [1] : vector<4x256xf32> to vector<4xf32>
    %112 = vector.shape_cast %111 : vector<4xf32> to vector<4x1xf32>
    %cst_55 = arith.constant 2.560000e+02 : f32
    %113 = vector.broadcast %cst_55 : f32 to vector<4x1xf32>
    %114 = arith.divf %112, %113 : vector<4x1xf32>
    %115 = vector.broadcast %105 : vector<4x1xf32> to vector<4x256xf32>
    %116 = arith.subf %64, %115 : vector<4x256xf32>
    %cst_56 = arith.constant 9.99999974E-6 : f32
    %117 = vector.broadcast %cst_56 : f32 to vector<4x1xf32>
    %118 = arith.addf %114, %117 : vector<4x1xf32>
    %119 = math.rsqrt %118 : vector<4x1xf32>
    %120 = vector.broadcast %119 : vector<4x1xf32> to vector<4x256xf32>
    %121 = arith.mulf %116, %120 : vector<4x256xf32>
    %cst_57 = arith.constant dense<0.000000e+00> : vector<4xf32>
    %122 = vector.multi_reduction <add>, %81, %cst_57 [1] : vector<4x256xf32> to vector<4xf32>
    %123 = vector.shape_cast %122 : vector<4xf32> to vector<4x1xf32>
    %cst_58 = arith.constant 2.560000e+02 : f32
    %124 = vector.broadcast %cst_58 : f32 to vector<4x1xf32>
    %125 = arith.divf %123, %124 : vector<4x1xf32>
    %126 = vector.broadcast %125 : vector<4x1xf32> to vector<4x256xf32>
    %127 = arith.subf %81, %126 : vector<4x256xf32>
    %128 = vector.broadcast %125 : vector<4x1xf32> to vector<4x256xf32>
    %129 = arith.subf %81, %128 : vector<4x256xf32>
    %130 = arith.mulf %127, %129 : vector<4x256xf32>
    %cst_59 = arith.constant dense<0.000000e+00> : vector<4xf32>
    %131 = vector.multi_reduction <add>, %130, %cst_59 [1] : vector<4x256xf32> to vector<4xf32>
    %132 = vector.shape_cast %131 : vector<4xf32> to vector<4x1xf32>
    %cst_60 = arith.constant 2.560000e+02 : f32
    %133 = vector.broadcast %cst_60 : f32 to vector<4x1xf32>
    %134 = arith.divf %132, %133 : vector<4x1xf32>
    %135 = vector.broadcast %125 : vector<4x1xf32> to vector<4x256xf32>
    %136 = arith.subf %81, %135 : vector<4x256xf32>
    %cst_61 = arith.constant 9.99999974E-6 : f32
    %137 = vector.broadcast %cst_61 : f32 to vector<4x1xf32>
    %138 = arith.addf %134, %137 : vector<4x1xf32>
    %139 = math.rsqrt %138 : vector<4x1xf32>
    %140 = vector.broadcast %139 : vector<4x1xf32> to vector<4x256xf32>
    %141 = arith.mulf %136, %140 : vector<4x256xf32>
    %c0_62 = arith.constant 0 : index
    %c0_63 = arith.constant 0 : index
    %c0_64 = arith.constant 0 : index
    %142 = vector.load %arg5[%c0_62, %c0_63, %c0_64] : memref<1x4x256xf32, #tpu.memory_space<vmem>>, vector<1x4x256xf32>
    %143 = vector.shape_cast %142 : vector<1x4x256xf32> to vector<4x256xf32>
    %144 = vector.shape_cast %13 : vector<4x256xf32> to vector<1x4x256xf32>
    tpu.vector_store %arg5[%c0_62, %c0_63, %c0_64], %144 {strides = array<i32>} : memref<1x4x256xf32, #tpu.memory_space<vmem>>, vector<1x4x256xf32>,
    %c0_65 = arith.constant 0 : index
    %c0_66 = arith.constant 0 : index
    %c0_67 = arith.constant 0 : index
    %145 = vector.load %arg6[%c0_65, %c0_66, %c0_67] : memref<1x4x256xf32, #tpu.memory_space<vmem>>, vector<1x4x256xf32>
    %146 = vector.shape_cast %145 : vector<1x4x256xf32> to vector<4x256xf32>
    %147 = vector.shape_cast %14 : vector<4x256xf32> to vector<1x4x256xf32>
    tpu.vector_store %arg6[%c0_65, %c0_66, %c0_67], %147 {strides = array<i32>} : memref<1x4x256xf32, #tpu.memory_space<vmem>>, vector<1x4x256xf32>,
    %c0_68 = arith.constant 0 : index
    %c0_69 = arith.constant 0 : index
    %c0_70 = arith.constant 0 : index
    %148 = vector.load %arg7[%c0_68, %c0_69, %c0_70] : memref<1x4x256xf32, #tpu.memory_space<vmem>>, vector<1x4x256xf32>
    %149 = vector.shape_cast %148 : vector<1x4x256xf32> to vector<4x256xf32>
    %150 = vector.shape_cast %101 : vector<4x256xf32> to vector<1x4x256xf32>
    tpu.vector_store %arg7[%c0_68, %c0_69, %c0_70], %150 {strides = array<i32>} : memref<1x4x256xf32, #tpu.memory_space<vmem>>, vector<1x4x256xf32>,
    %c0_71 = arith.constant 0 : index
    %c0_72 = arith.constant 0 : index
    %c0_73 = arith.constant 0 : index
    %151 = vector.load %arg8[%c0_71, %c0_72, %c0_73] : memref<1x4x256xf32, #tpu.memory_space<vmem>>, vector<1x4x256xf32>
    %152 = vector.shape_cast %151 : vector<1x4x256xf32> to vector<4x256xf32>
    %153 = vector.shape_cast %121 : vector<4x256xf32> to vector<1x4x256xf32>
    tpu.vector_store %arg8[%c0_71, %c0_72, %c0_73], %153 {strides = array<i32>} : memref<1x4x256xf32, #tpu.memory_space<vmem>>, vector<1x4x256xf32>,
    %c0_74 = arith.constant 0 : index
    %c0_75 = arith.constant 0 : index
    %c0_76 = arith.constant 0 : index
    %154 = vector.load %arg9[%c0_74, %c0_75, %c0_76] : memref<1x4x256xf32, #tpu.memory_space<vmem>>, vector<1x4x256xf32>
    %155 = vector.shape_cast %154 : vector<1x4x256xf32> to vector<4x256xf32>
    %156 = vector.shape_cast %141 : vector<4x256xf32> to vector<1x4x256xf32>
    tpu.vector_store %arg9[%c0_74, %c0_75, %c0_76], %156 {strides = array<i32>} : memref<1x4x256xf32, #tpu.memory_space<vmem>>, vector<1x4x256xf32>,
    %c6 = arith.constant 6 : index
    %c0_77 = arith.constant 0 : index
    %c0_78 = arith.constant 0 : index
    %157 = vector.load %arg2[%c6, %c0_77, %c0_78] : memref<10x4x4xf32, #tpu.memory_space<vmem>>, vector<1x4x4xf32>
    %158 = vector.shape_cast %157 : vector<1x4x4xf32> to vector<4x4xf32>
    %cst_79 = arith.constant dense<0.000000e+00> : vector<4x256xf32>
    %159 = tpu.matmul %158, %1, %cst_79 {dimension_numbers = #tpu.dot_dimension_numbers<[1], [0], [0], [1], [0, 0, 1, 1], [], []>} : vector<4x4xf32>, vector<4x256xf32>, vector<4x256xf32> -> vector<4x256xf32>
    %c6_80 = arith.constant 6 : index
    %c0_81 = arith.constant 0 : index
    %c0_82 = arith.constant 0 : index
    %160 = vector.load %arg3[%c6_80, %c0_81, %c0_82] : memref<10x4x1xf32, #tpu.memory_space<vmem>>, vector<1x4x1xf32>
    %161 = vector.shape_cast %160 : vector<1x4x1xf32> to vector<4x1xf32>
    %162 = vector.broadcast %161 : vector<4x1xf32> to vector<4x256xf32>
    %163 = arith.addf %159, %162 : vector<4x256xf32>
    %c0_83 = arith.constant 0 : index
    %c0_84 = arith.constant 0 : index
    %c0_85 = arith.constant 0 : index
    %164 = vector.load %arg10[%c0_83, %c0_84, %c0_85] : memref<1x4x256xf32, #tpu.memory_space<vmem>>, vector<1x4x256xf32>
    %165 = vector.shape_cast %164 : vector<1x4x256xf32> to vector<4x256xf32>
    %166 = vector.shape_cast %163 : vector<4x256xf32> to vector<1x4x256xf32>
    tpu.vector_store %arg10[%c0_83, %c0_84, %c0_85], %166 {strides = array<i32>} : memref<1x4x256xf32, #tpu.memory_space<vmem>>, vector<1x4x256xf32>,
    %c7 = arith.constant 7 : index
    %c0_86 = arith.constant 0 : index
    %c0_87 = arith.constant 0 : index
    %167 = vector.load %arg2[%c7, %c0_86, %c0_87] : memref<10x4x4xf32, #tpu.memory_space<vmem>>, vector<1x4x4xf32>
    %168 = vector.shape_cast %167 : vector<1x4x4xf32> to vector<4x4xf32>
    %cst_88 = arith.constant dense<0.000000e+00> : vector<4x256xf32>
    %169 = tpu.matmul %168, %141, %cst_88 {dimension_numbers = #tpu.dot_dimension_numbers<[1], [0], [0], [1], [0, 0, 1, 1], [], []>} : vector<4x4xf32>, vector<4x256xf32>, vector<4x256xf32> -> vector<4x256xf32>
    %c7_89 = arith.constant 7 : index
    %c0_90 = arith.constant 0 : index
    %c0_91 = arith.constant 0 : index
    %170 = vector.load %arg3[%c7_89, %c0_90, %c0_91] : memref<10x4x1xf32, #tpu.memory_space<vmem>>, vector<1x4x1xf32>
    %171 = vector.shape_cast %170 : vector<1x4x1xf32> to vector<4x1xf32>
    %172 = vector.broadcast %171 : vector<4x1xf32> to vector<4x256xf32>
    %173 = arith.addf %169, %172 : vector<4x256xf32>
    %c0_92 = arith.constant 0 : index
    %c0_93 = arith.constant 0 : index
    %c0_94 = arith.constant 0 : index
    %174 = vector.load %arg11[%c0_92, %c0_93, %c0_94] : memref<1x4x256xf32, #tpu.memory_space<vmem>>, vector<1x4x256xf32>
    %175 = vector.shape_cast %174 : vector<1x4x256xf32> to vector<4x256xf32>
    %176 = vector.shape_cast %173 : vector<4x256xf32> to vector<1x4x256xf32>
    tpu.vector_store %arg11[%c0_92, %c0_93, %c0_94], %176 {strides = array<i32>} : memref<1x4x256xf32, #tpu.memory_space<vmem>>, vector<1x4x256xf32>,
    %c8 = arith.constant 8 : index
    %c0_95 = arith.constant 0 : index
    %c0_96 = arith.constant 0 : index
    %177 = vector.load %arg2[%c8, %c0_95, %c0_96] : memref<10x4x4xf32, #tpu.memory_space<vmem>>, vector<1x4x4xf32>
    %178 = vector.shape_cast %177 : vector<1x4x4xf32> to vector<4x4xf32>
    %cst_97 = arith.constant dense<0.000000e+00> : vector<4x256xf32>
    %179 = tpu.matmul %178, %121, %cst_97 {dimension_numbers = #tpu.dot_dimension_numbers<[1], [0], [0], [1], [0, 0, 1, 1], [], []>} : vector<4x4xf32>, vector<4x256xf32>, vector<4x256xf32> -> vector<4x256xf32>
    %c8_98 = arith.constant 8 : index
    %c0_99 = arith.constant 0 : index
    %c0_100 = arith.constant 0 : index
    %180 = vector.load %arg3[%c8_98, %c0_99, %c0_100] : memref<10x4x1xf32, #tpu.memory_space<vmem>>, vector<1x4x1xf32>
    %181 = vector.shape_cast %180 : vector<1x4x1xf32> to vector<4x1xf32>
    %182 = vector.broadcast %181 : vector<4x1xf32> to vector<4x256xf32>
    %183 = arith.addf %179, %182 : vector<4x256xf32>
    %c0_101 = arith.constant 0 : index
    %c0_102 = arith.constant 0 : index
    %c0_103 = arith.constant 0 : index
    %184 = vector.load %arg12[%c0_101, %c0_102, %c0_103] : memref<1x4x256xf32, #tpu.memory_space<vmem>>, vector<1x4x256xf32>
    %185 = vector.shape_cast %184 : vector<1x4x256xf32> to vector<4x256xf32>
    %186 = vector.shape_cast %183 : vector<4x256xf32> to vector<1x4x256xf32>
    tpu.vector_store %arg12[%c0_101, %c0_102, %c0_103], %186 {strides = array<i32>} : memref<1x4x256xf32, #tpu.memory_space<vmem>>, vector<1x4x256xf32>,
    %c9 = arith.constant 9 : index
    %c0_104 = arith.constant 0 : index
    %c0_105 = arith.constant 0 : index
    %187 = vector.load %arg2[%c9, %c0_104, %c0_105] : memref<10x4x4xf32, #tpu.memory_space<vmem>>, vector<1x4x4xf32>
    %188 = vector.shape_cast %187 : vector<1x4x4xf32> to vector<4x4xf32>
    %cst_106 = arith.constant dense<0.000000e+00> : vector<4x256xf32>
    %189 = tpu.matmul %188, %1, %cst_106 {dimension_numbers = #tpu.dot_dimension_numbers<[1], [0], [0], [1], [0, 0, 1, 1], [], []>} : vector<4x4xf32>, vector<4x256xf32>, vector<4x256xf32> -> vector<4x256xf32>
    %c9_107 = arith.constant 9 : index
    %c0_108 = arith.constant 0 : index
    %c0_109 = arith.constant 0 : index
    %190 = vector.load %arg3[%c9_107, %c0_108, %c0_109] : memref<10x4x1xf32, #tpu.memory_space<vmem>>, vector<1x4x1xf32>
    %191 = vector.shape_cast %190 : vector<1x4x1xf32> to vector<4x1xf32>
    %192 = vector.broadcast %191 : vector<4x1xf32> to vector<4x256xf32>
    %193 = arith.addf %189, %192 : vector<4x256xf32>
    %c0_110 = arith.constant 0 : index
    %c0_111 = arith.constant 0 : index
    %c0_112 = arith.constant 0 : index
    %194 = vector.load %arg13[%c0_110, %c0_111, %c0_112] : memref<1x4x256xf32, #tpu.memory_space<vmem>>, vector<1x4x256xf32>
    %195 = vector.shape_cast %194 : vector<1x4x256xf32> to vector<4x256xf32>
    %196 = vector.shape_cast %193 : vector<4x256xf32> to vector<1x4x256xf32>
    tpu.vector_store %arg13[%c0_110, %c0_111, %c0_112], %196 {strides = array<i32>} : memref<1x4x256xf32, #tpu.memory_space<vmem>>, vector<1x4x256xf32>,
    return
  }
  func.func @transform_0(%arg0: i32) -> (i32, i32, i32) {
    %c0_i32 = arith.constant 0 : i32
    %c0_i32_0 = arith.constant 0 : i32
    %c0_i32_1 = arith.constant 0 : i32
    return %arg0, %c0_i32, %c0_i32_0 : i32, i32, i32
  }
  func.func @transform_1(%arg0: i32) -> (i32, i32, i32) {
    %c0_i32 = arith.constant 0 : i32
    %c0_i32_0 = arith.constant 0 : i32
    %c0_i32_1 = arith.constant 0 : i32
    %c0_i32_2 = arith.constant 0 : i32
    return %c0_i32, %c0_i32_0, %c0_i32_1 : i32, i32, i32
  }
  func.func @transform_2(%arg0: i32) -> (i32, i32, i32) {
    %c0_i32 = arith.constant 0 : i32
    %c0_i32_0 = arith.constant 0 : i32
    %c0_i32_1 = arith.constant 0 : i32
    %c0_i32_2 = arith.constant 0 : i32
    return %c0_i32, %c0_i32_0, %c0_i32_1 : i32, i32, i32
  }
  func.func @transform_3(%arg0: i32) -> (i32, i32) {
    %c0_i32 = arith.constant 0 : i32
    %c0_i32_0 = arith.constant 0 : i32
    %c0_i32_1 = arith.constant 0 : i32
    return %c0_i32, %c0_i32_0 : i32, i32
  }
  func.func @transform_4(%arg0: i32) -> (i32, i32, i32) {
    %c0_i32 = arith.constant 0 : i32
    %c0_i32_0 = arith.constant 0 : i32
    %c0_i32_1 = arith.constant 0 : i32
    return %arg0, %c0_i32, %c0_i32_0 : i32, i32, i32
  }
  func.func @transform_5(%arg0: i32) -> (i32, i32, i32) {
    %c0_i32 = arith.constant 0 : i32
    %c0_i32_0 = arith.constant 0 : i32
    %c0_i32_1 = arith.constant 0 : i32
    return %arg0, %c0_i32, %c0_i32_0 : i32, i32, i32
  }
  func.func @transform_6(%arg0: i32) -> (i32, i32, i32) {
    %c0_i32 = arith.constant 0 : i32
    %c0_i32_0 = arith.constant 0 : i32
    %c0_i32_1 = arith.constant 0 : i32
    return %arg0, %c0_i32, %c0_i32_0 : i32, i32, i32
  }
  func.func @transform_7(%arg0: i32) -> (i32, i32, i32) {
    %c0_i32 = arith.constant 0 : i32
    %c0_i32_0 = arith.constant 0 : i32
    %c0_i32_1 = arith.constant 0 : i32
    return %arg0, %c0_i32, %c0_i32_0 : i32, i32, i32
  }
  func.func @transform_8(%arg0: i32) -> (i32, i32, i32) {
    %c0_i32 = arith.constant 0 : i32
    %c0_i32_0 = arith.constant 0 : i32
    %c0_i32_1 = arith.constant 0 : i32
    return %arg0, %c0_i32, %c0_i32_0 : i32, i32, i32
  }
  func.func @transform_9(%arg0: i32) -> (i32, i32, i32) {
    %c0_i32 = arith.constant 0 : i32
    %c0_i32_0 = arith.constant 0 : i32
    %c0_i32_1 = arith.constant 0 : i32
    return %arg0, %c0_i32, %c0_i32_0 : i32, i32, i32
  }
  func.func @transform_10(%arg0: i32) -> (i32, i32, i32) {
    %c0_i32 = arith.constant 0 : i32
    %c0_i32_0 = arith.constant 0 : i32
    %c0_i32_1 = arith.constant 0 : i32
    return %arg0, %c0_i32, %c0_i32_0 : i32, i32, i32
  }
  func.func @transform_11(%arg0: i32) -> (i32, i32, i32) {
    %c0_i32 = arith.constant 0 : i32
    %c0_i32_0 = arith.constant 0 : i32
    %c0_i32_1 = arith.constant 0 : i32
    return %arg0, %c0_i32, %c0_i32_0 : i32, i32, i32
  }
  func.func @transform_12(%arg0: i32) -> (i32, i32, i32) {
    %c0_i32 = arith.constant 0 : i32
    %c0_i32_0 = arith.constant 0 : i32
    %c0_i32_1 = arith.constant 0 : i32
    return %arg0, %c0_i32, %c0_i32_0 : i32, i32, i32
  }
}

module attributes {stable_mosaic.version = 11 : i64} {
  func.func @_spatial_kernel(%arg0: i32, %arg1: memref<1x64x16xf32, #tpu.memory_space<vmem>>, %arg2: memref<1x64x16xf32, #tpu.memory_space<vmem>>, %arg3: memref<1x64x16xf32, #tpu.memory_space<vmem>>, %arg4: memref<1x64x16xf32, #tpu.memory_space<vmem>>, %arg5: memref<1x64x16xf32, #tpu.memory_space<vmem>>, %arg6: memref<1x64x16xf32, #tpu.memory_space<vmem>>, %arg7: memref<1x64x16xf32, #tpu.memory_space<vmem>>) attributes {dimension_semantics = [#tpu.dimension_semantics<parallel>], iteration_bounds = array<i64: 2>, scalar_prefetch = 0 : i64, scratch_operands = 0 : i64, tpu.core_type = #tpu.core_type<tc>, window_params = [{transform_indices = @transform_0, window_bounds = array<i64: 1, 64, 16>}, {transform_indices = @transform_1, window_bounds = array<i64: 1, 64, 16>}, {transform_indices = @transform_2, window_bounds = array<i64: 1, 64, 16>}, {transform_indices = @transform_3, window_bounds = array<i64: 1, 64, 16>}, {transform_indices = @transform_4, window_bounds = array<i64: 1, 64, 16>}, {transform_indices = @transform_5, window_bounds = array<i64: 1, 64, 16>}, {transform_indices = @transform_6, window_bounds = array<i64: 1, 64, 16>}]} {
    %c0 = arith.constant 0 : index
    %c0_0 = arith.constant 0 : index
    %c0_1 = arith.constant 0 : index
    %0 = vector.load %arg1[%c0, %c0_0, %c0_1] : memref<1x64x16xf32, #tpu.memory_space<vmem>>, vector<1x64x16xf32>
    %1 = vector.shape_cast %0 : vector<1x64x16xf32> to vector<64x16xf32>
    %c0_2 = arith.constant 0 : index
    %c0_3 = arith.constant 0 : index
    %c0_4 = arith.constant 0 : index
    %2 = vector.load %arg2[%c0_2, %c0_3, %c0_4] : memref<1x64x16xf32, #tpu.memory_space<vmem>>, vector<1x64x16xf32>
    %3 = vector.shape_cast %2 : vector<1x64x16xf32> to vector<64x16xf32>
    %c0_5 = arith.constant 0 : index
    %c0_6 = arith.constant 0 : index
    %c0_7 = arith.constant 0 : index
    %4 = vector.load %arg3[%c0_5, %c0_6, %c0_7] : memref<1x64x16xf32, #tpu.memory_space<vmem>>, vector<1x64x16xf32>
    %5 = vector.shape_cast %4 : vector<1x64x16xf32> to vector<64x16xf32>
    %c0_8 = arith.constant 0 : index
    %c0_9 = arith.constant 0 : index
    %c0_10 = arith.constant 0 : index
    %6 = vector.load %arg4[%c0_8, %c0_9, %c0_10] : memref<1x64x16xf32, #tpu.memory_space<vmem>>, vector<1x64x16xf32>
    %7 = vector.shape_cast %6 : vector<1x64x16xf32> to vector<64x16xf32>
    %8 = vector.extract_strided_slice %1 {offsets = [0, 0], sizes = [16, 16], strides = [1, 1]} : vector<64x16xf32> to vector<16x16xf32>
    %9 = vector.extract_strided_slice %3 {offsets = [0, 0], sizes = [16, 16], strides = [1, 1]} : vector<64x16xf32> to vector<16x16xf32>
    %cst = arith.constant dense<0.000000e+00> : vector<16x16xf32>
    %10 = tpu.matmul %8, %9, %cst {dimension_numbers = #tpu.dot_dimension_numbers<[1], [0], [0], [1], [0, 0, 1, 1], [], []>} : vector<16x16xf32>, vector<16x16xf32>, vector<16x16xf32> -> vector<16x16xf32>
    %11 = vector.extract_strided_slice %5 {offsets = [0, 0], sizes = [16, 16], strides = [1, 1]} : vector<64x16xf32> to vector<16x16xf32>
    %cst_11 = arith.constant dense<0.000000e+00> : vector<16x16xf32>
    %12 = tpu.matmul %8, %11, %cst_11 {dimension_numbers = #tpu.dot_dimension_numbers<[1], [0], [0], [1], [0, 0, 1, 1], [], []>} : vector<16x16xf32>, vector<16x16xf32>, vector<16x16xf32> -> vector<16x16xf32>
    %13 = vector.extract_strided_slice %7 {offsets = [0, 0], sizes = [16, 16], strides = [1, 1]} : vector<64x16xf32> to vector<16x16xf32>
    %cst_12 = arith.constant dense<0.000000e+00> : vector<16x16xf32>
    %14 = tpu.matmul %8, %13, %cst_12 {dimension_numbers = #tpu.dot_dimension_numbers<[1], [0], [0], [1], [0, 0, 1, 1], [], []>} : vector<16x16xf32>, vector<16x16xf32>, vector<16x16xf32> -> vector<16x16xf32>
    %15 = vector.extract_strided_slice %1 {offsets = [16, 0], sizes = [16, 16], strides = [1, 1]} : vector<64x16xf32> to vector<16x16xf32>
    %16 = vector.extract_strided_slice %3 {offsets = [16, 0], sizes = [16, 16], strides = [1, 1]} : vector<64x16xf32> to vector<16x16xf32>
    %cst_13 = arith.constant dense<0.000000e+00> : vector<16x16xf32>
    %17 = tpu.matmul %15, %16, %cst_13 {dimension_numbers = #tpu.dot_dimension_numbers<[1], [0], [0], [1], [0, 0, 1, 1], [], []>} : vector<16x16xf32>, vector<16x16xf32>, vector<16x16xf32> -> vector<16x16xf32>
    %18 = vector.extract_strided_slice %5 {offsets = [16, 0], sizes = [16, 16], strides = [1, 1]} : vector<64x16xf32> to vector<16x16xf32>
    %cst_14 = arith.constant dense<0.000000e+00> : vector<16x16xf32>
    %19 = tpu.matmul %15, %18, %cst_14 {dimension_numbers = #tpu.dot_dimension_numbers<[1], [0], [0], [1], [0, 0, 1, 1], [], []>} : vector<16x16xf32>, vector<16x16xf32>, vector<16x16xf32> -> vector<16x16xf32>
    %20 = vector.extract_strided_slice %7 {offsets = [16, 0], sizes = [16, 16], strides = [1, 1]} : vector<64x16xf32> to vector<16x16xf32>
    %cst_15 = arith.constant dense<0.000000e+00> : vector<16x16xf32>
    %21 = tpu.matmul %15, %20, %cst_15 {dimension_numbers = #tpu.dot_dimension_numbers<[1], [0], [0], [1], [0, 0, 1, 1], [], []>} : vector<16x16xf32>, vector<16x16xf32>, vector<16x16xf32> -> vector<16x16xf32>
    %22 = vector.extract_strided_slice %1 {offsets = [32, 0], sizes = [16, 16], strides = [1, 1]} : vector<64x16xf32> to vector<16x16xf32>
    %23 = vector.extract_strided_slice %3 {offsets = [32, 0], sizes = [16, 16], strides = [1, 1]} : vector<64x16xf32> to vector<16x16xf32>
    %cst_16 = arith.constant dense<0.000000e+00> : vector<16x16xf32>
    %24 = tpu.matmul %22, %23, %cst_16 {dimension_numbers = #tpu.dot_dimension_numbers<[1], [0], [0], [1], [0, 0, 1, 1], [], []>} : vector<16x16xf32>, vector<16x16xf32>, vector<16x16xf32> -> vector<16x16xf32>
    %25 = vector.extract_strided_slice %5 {offsets = [32, 0], sizes = [16, 16], strides = [1, 1]} : vector<64x16xf32> to vector<16x16xf32>
    %cst_17 = arith.constant dense<0.000000e+00> : vector<16x16xf32>
    %26 = tpu.matmul %22, %25, %cst_17 {dimension_numbers = #tpu.dot_dimension_numbers<[1], [0], [0], [1], [0, 0, 1, 1], [], []>} : vector<16x16xf32>, vector<16x16xf32>, vector<16x16xf32> -> vector<16x16xf32>
    %27 = vector.extract_strided_slice %7 {offsets = [32, 0], sizes = [16, 16], strides = [1, 1]} : vector<64x16xf32> to vector<16x16xf32>
    %cst_18 = arith.constant dense<0.000000e+00> : vector<16x16xf32>
    %28 = tpu.matmul %22, %27, %cst_18 {dimension_numbers = #tpu.dot_dimension_numbers<[1], [0], [0], [1], [0, 0, 1, 1], [], []>} : vector<16x16xf32>, vector<16x16xf32>, vector<16x16xf32> -> vector<16x16xf32>
    %29 = vector.extract_strided_slice %1 {offsets = [48, 0], sizes = [16, 16], strides = [1, 1]} : vector<64x16xf32> to vector<16x16xf32>
    %30 = vector.extract_strided_slice %3 {offsets = [48, 0], sizes = [16, 16], strides = [1, 1]} : vector<64x16xf32> to vector<16x16xf32>
    %cst_19 = arith.constant dense<0.000000e+00> : vector<16x16xf32>
    %31 = tpu.matmul %29, %30, %cst_19 {dimension_numbers = #tpu.dot_dimension_numbers<[1], [0], [0], [1], [0, 0, 1, 1], [], []>} : vector<16x16xf32>, vector<16x16xf32>, vector<16x16xf32> -> vector<16x16xf32>
    %32 = vector.extract_strided_slice %5 {offsets = [48, 0], sizes = [16, 16], strides = [1, 1]} : vector<64x16xf32> to vector<16x16xf32>
    %cst_20 = arith.constant dense<0.000000e+00> : vector<16x16xf32>
    %33 = tpu.matmul %29, %32, %cst_20 {dimension_numbers = #tpu.dot_dimension_numbers<[1], [0], [0], [1], [0, 0, 1, 1], [], []>} : vector<16x16xf32>, vector<16x16xf32>, vector<16x16xf32> -> vector<16x16xf32>
    %34 = vector.extract_strided_slice %7 {offsets = [48, 0], sizes = [16, 16], strides = [1, 1]} : vector<64x16xf32> to vector<16x16xf32>
    %cst_21 = arith.constant dense<0.000000e+00> : vector<16x16xf32>
    %35 = tpu.matmul %29, %34, %cst_21 {dimension_numbers = #tpu.dot_dimension_numbers<[1], [0], [0], [1], [0, 0, 1, 1], [], []>} : vector<16x16xf32>, vector<16x16xf32>, vector<16x16xf32> -> vector<16x16xf32>
    %36 = tpu.concatenate %10, %17, %24, %31 in 0 : vector<16x16xf32>, vector<16x16xf32>, vector<16x16xf32>, vector<16x16xf32> -> vector<64x16xf32>
    %c0_22 = arith.constant 0 : index
    %c0_23 = arith.constant 0 : index
    %c0_24 = arith.constant 0 : index
    %37 = vector.load %arg5[%c0_22, %c0_23, %c0_24] : memref<1x64x16xf32, #tpu.memory_space<vmem>>, vector<1x64x16xf32>
    %38 = vector.shape_cast %37 : vector<1x64x16xf32> to vector<64x16xf32>
    %39 = vector.shape_cast %36 : vector<64x16xf32> to vector<1x64x16xf32>
    tpu.vector_store %arg5[%c0_22, %c0_23, %c0_24], %39 {strides = array<i32>} : memref<1x64x16xf32, #tpu.memory_space<vmem>>, vector<1x64x16xf32>,
    %40 = tpu.concatenate %12, %19, %26, %33 in 0 : vector<16x16xf32>, vector<16x16xf32>, vector<16x16xf32>, vector<16x16xf32> -> vector<64x16xf32>
    %c0_25 = arith.constant 0 : index
    %c0_26 = arith.constant 0 : index
    %c0_27 = arith.constant 0 : index
    %41 = vector.load %arg6[%c0_25, %c0_26, %c0_27] : memref<1x64x16xf32, #tpu.memory_space<vmem>>, vector<1x64x16xf32>
    %42 = vector.shape_cast %41 : vector<1x64x16xf32> to vector<64x16xf32>
    %43 = vector.shape_cast %40 : vector<64x16xf32> to vector<1x64x16xf32>
    tpu.vector_store %arg6[%c0_25, %c0_26, %c0_27], %43 {strides = array<i32>} : memref<1x64x16xf32, #tpu.memory_space<vmem>>, vector<1x64x16xf32>,
    %44 = tpu.concatenate %14, %21, %28, %35 in 0 : vector<16x16xf32>, vector<16x16xf32>, vector<16x16xf32>, vector<16x16xf32> -> vector<64x16xf32>
    %c0_28 = arith.constant 0 : index
    %c0_29 = arith.constant 0 : index
    %c0_30 = arith.constant 0 : index
    %45 = vector.load %arg7[%c0_28, %c0_29, %c0_30] : memref<1x64x16xf32, #tpu.memory_space<vmem>>, vector<1x64x16xf32>
    %46 = vector.shape_cast %45 : vector<1x64x16xf32> to vector<64x16xf32>
    %47 = vector.shape_cast %44 : vector<64x16xf32> to vector<1x64x16xf32>
    tpu.vector_store %arg7[%c0_28, %c0_29, %c0_30], %47 {strides = array<i32>} : memref<1x64x16xf32, #tpu.memory_space<vmem>>, vector<1x64x16xf32>,
    return
  }
  func.func @transform_0(%arg0: i32) -> (i32, i32, i32) {
    %c0_i32 = arith.constant 0 : i32
    %c0_i32_0 = arith.constant 0 : i32
    %c0_i32_1 = arith.constant 0 : i32
    return %arg0, %c0_i32, %c0_i32_0 : i32, i32, i32
  }
  func.func @transform_1(%arg0: i32) -> (i32, i32, i32) {
    %c0_i32 = arith.constant 0 : i32
    %c0_i32_0 = arith.constant 0 : i32
    %c0_i32_1 = arith.constant 0 : i32
    return %arg0, %c0_i32, %c0_i32_0 : i32, i32, i32
  }
  func.func @transform_2(%arg0: i32) -> (i32, i32, i32) {
    %c0_i32 = arith.constant 0 : i32
    %c0_i32_0 = arith.constant 0 : i32
    %c0_i32_1 = arith.constant 0 : i32
    return %arg0, %c0_i32, %c0_i32_0 : i32, i32, i32
  }
  func.func @transform_3(%arg0: i32) -> (i32, i32, i32) {
    %c0_i32 = arith.constant 0 : i32
    %c0_i32_0 = arith.constant 0 : i32
    %c0_i32_1 = arith.constant 0 : i32
    return %arg0, %c0_i32, %c0_i32_0 : i32, i32, i32
  }
  func.func @transform_4(%arg0: i32) -> (i32, i32, i32) {
    %c0_i32 = arith.constant 0 : i32
    %c0_i32_0 = arith.constant 0 : i32
    %c0_i32_1 = arith.constant 0 : i32
    return %arg0, %c0_i32, %c0_i32_0 : i32, i32, i32
  }
  func.func @transform_5(%arg0: i32) -> (i32, i32, i32) {
    %c0_i32 = arith.constant 0 : i32
    %c0_i32_0 = arith.constant 0 : i32
    %c0_i32_1 = arith.constant 0 : i32
    return %arg0, %c0_i32, %c0_i32_0 : i32, i32, i32
  }
  func.func @transform_6(%arg0: i32) -> (i32, i32, i32) {
    %c0_i32 = arith.constant 0 : i32
    %c0_i32_0 = arith.constant 0 : i32
    %c0_i32_1 = arith.constant 0 : i32
    return %arg0, %c0_i32, %c0_i32_0 : i32, i32, i32
  }
}

module attributes {stable_mosaic.version = 11 : i64} {
  func.func @_post_kernel(%arg0: i32, %arg1: memref<1x4x256xf32, #tpu.memory_space<vmem>>, %arg2: memref<1x4x256xf32, #tpu.memory_space<vmem>>, %arg3: memref<1x4x256xf32, #tpu.memory_space<vmem>>, %arg4: memref<1x4x256xf32, #tpu.memory_space<vmem>>, %arg5: memref<1x4x256xf32, #tpu.memory_space<vmem>>, %arg6: memref<1x4x256xf32, #tpu.memory_space<vmem>>, %arg7: memref<1x4x256xf32, #tpu.memory_space<vmem>>, %arg8: memref<1x4x256xf32, #tpu.memory_space<vmem>>, %arg9: memref<1x4x256xf32, #tpu.memory_space<vmem>>, %arg10: memref<1x4x256xf32, #tpu.memory_space<vmem>>, %arg11: memref<1x4x256xf32, #tpu.memory_space<vmem>>, %arg12: memref<4x4xf32, #tpu.memory_space<vmem>>, %arg13: memref<10x8x4xf32, #tpu.memory_space<vmem>>, %arg14: memref<8x1xf32, #tpu.memory_space<vmem>>, %arg15: memref<4x1xf32, #tpu.memory_space<vmem>>, %arg16: memref<1x8x256xf32, #tpu.memory_space<vmem>>) attributes {dimension_semantics = [#tpu.dimension_semantics<parallel>], iteration_bounds = array<i64: 2>, scalar_prefetch = 0 : i64, scratch_operands = 0 : i64, tpu.core_type = #tpu.core_type<tc>, window_params = [{transform_indices = @transform_0, window_bounds = array<i64: 1, 4, 256>}, {transform_indices = @transform_1, window_bounds = array<i64: 1, 4, 256>}, {transform_indices = @transform_2, window_bounds = array<i64: 1, 4, 256>}, {transform_indices = @transform_3, window_bounds = array<i64: 1, 4, 256>}, {transform_indices = @transform_4, window_bounds = array<i64: 1, 4, 256>}, {transform_indices = @transform_5, window_bounds = array<i64: 1, 4, 256>}, {transform_indices = @transform_6, window_bounds = array<i64: 1, 4, 256>}, {transform_indices = @transform_7, window_bounds = array<i64: 1, 4, 256>}, {transform_indices = @transform_8, window_bounds = array<i64: 1, 4, 256>}, {transform_indices = @transform_9, window_bounds = array<i64: 1, 4, 256>}, {transform_indices = @transform_10, window_bounds = array<i64: 1, 4, 256>}, {pipeline_mode = #tpu.pipeline_mode<synchronous>, transform_indices = @transform_11, window_bounds = array<i64: 4, 4>}, {pipeline_mode = #tpu.pipeline_mode<synchronous>, transform_indices = @transform_12, window_bounds = array<i64: 10, 8, 4>}, {pipeline_mode = #tpu.pipeline_mode<synchronous>, transform_indices = @transform_13, window_bounds = array<i64: 8, 1>}, {pipeline_mode = #tpu.pipeline_mode<synchronous>, transform_indices = @transform_14, window_bounds = array<i64: 4, 1>}, {transform_indices = @transform_15, window_bounds = array<i64: 1, 8, 256>}]} {
    %c0 = arith.constant 0 : index
    %c0_0 = arith.constant 0 : index
    %c0_1 = arith.constant 0 : index
    %0 = vector.load %arg1[%c0, %c0_0, %c0_1] : memref<1x4x256xf32, #tpu.memory_space<vmem>>, vector<1x4x256xf32>
    %1 = vector.shape_cast %0 : vector<1x4x256xf32> to vector<4x256xf32>
    %c0_2 = arith.constant 0 : index
    %c0_3 = arith.constant 0 : index
    %c0_4 = arith.constant 0 : index
    %2 = vector.load %arg2[%c0_2, %c0_3, %c0_4] : memref<1x4x256xf32, #tpu.memory_space<vmem>>, vector<1x4x256xf32>
    %3 = vector.shape_cast %2 : vector<1x4x256xf32> to vector<4x256xf32>
    %c0_5 = arith.constant 0 : index
    %c0_6 = arith.constant 0 : index
    %c0_7 = arith.constant 0 : index
    %4 = vector.load %arg3[%c0_5, %c0_6, %c0_7] : memref<1x4x256xf32, #tpu.memory_space<vmem>>, vector<1x4x256xf32>
    %5 = vector.shape_cast %4 : vector<1x4x256xf32> to vector<4x256xf32>
    %c0_8 = arith.constant 0 : index
    %c0_9 = arith.constant 0 : index
    %c0_10 = arith.constant 0 : index
    %6 = vector.load %arg4[%c0_8, %c0_9, %c0_10] : memref<1x4x256xf32, #tpu.memory_space<vmem>>, vector<1x4x256xf32>
    %7 = vector.shape_cast %6 : vector<1x4x256xf32> to vector<4x256xf32>
    %c0_11 = arith.constant 0 : index
    %c0_12 = arith.constant 0 : index
    %c0_13 = arith.constant 0 : index
    %8 = vector.load %arg5[%c0_11, %c0_12, %c0_13] : memref<1x4x256xf32, #tpu.memory_space<vmem>>, vector<1x4x256xf32>
    %9 = vector.shape_cast %8 : vector<1x4x256xf32> to vector<4x256xf32>
    %c0_14 = arith.constant 0 : index
    %c0_15 = arith.constant 0 : index
    %c0_16 = arith.constant 0 : index
    %10 = vector.load %arg6[%c0_14, %c0_15, %c0_16] : memref<1x4x256xf32, #tpu.memory_space<vmem>>, vector<1x4x256xf32>
    %11 = vector.shape_cast %10 : vector<1x4x256xf32> to vector<4x256xf32>
    %c0_17 = arith.constant 0 : index
    %c0_18 = arith.constant 0 : index
    %c0_19 = arith.constant 0 : index
    %12 = vector.load %arg7[%c0_17, %c0_18, %c0_19] : memref<1x4x256xf32, #tpu.memory_space<vmem>>, vector<1x4x256xf32>
    %13 = vector.shape_cast %12 : vector<1x4x256xf32> to vector<4x256xf32>
    %c0_20 = arith.constant 0 : index
    %c0_21 = arith.constant 0 : index
    %c0_22 = arith.constant 0 : index
    %14 = vector.load %arg8[%c0_20, %c0_21, %c0_22] : memref<1x4x256xf32, #tpu.memory_space<vmem>>, vector<1x4x256xf32>
    %15 = vector.shape_cast %14 : vector<1x4x256xf32> to vector<4x256xf32>
    %c0_23 = arith.constant 0 : index
    %c0_24 = arith.constant 0 : index
    %c0_25 = arith.constant 0 : index
    %16 = vector.load %arg9[%c0_23, %c0_24, %c0_25] : memref<1x4x256xf32, #tpu.memory_space<vmem>>, vector<1x4x256xf32>
    %17 = vector.shape_cast %16 : vector<1x4x256xf32> to vector<4x256xf32>
    %c0_26 = arith.constant 0 : index
    %c0_27 = arith.constant 0 : index
    %c0_28 = arith.constant 0 : index
    %18 = vector.load %arg10[%c0_26, %c0_27, %c0_28] : memref<1x4x256xf32, #tpu.memory_space<vmem>>, vector<1x4x256xf32>
    %19 = vector.shape_cast %18 : vector<1x4x256xf32> to vector<4x256xf32>
    %c0_29 = arith.constant 0 : index
    %c0_30 = arith.constant 0 : index
    %c0_31 = arith.constant 0 : index
    %20 = vector.load %arg11[%c0_29, %c0_30, %c0_31] : memref<1x4x256xf32, #tpu.memory_space<vmem>>, vector<1x4x256xf32>
    %21 = vector.shape_cast %20 : vector<1x4x256xf32> to vector<4x256xf32>
    %c0_32 = arith.constant 0 : index
    %c0_33 = arith.constant 0 : index
    %22 = vector.load %arg15[%c0_32, %c0_33] : memref<4x1xf32, #tpu.memory_space<vmem>>, vector<4x1xf32>
    %23 = arith.negf %3 : vector<4x256xf32>
    %24 = math.exp %23 : vector<4x256xf32>
    %cst = arith.constant 1.000000e+00 : f32
    %25 = vector.broadcast %cst : f32 to vector<4x256xf32>
    %26 = arith.addf %25, %24 : vector<4x256xf32>
    %27 = arith.divf %25, %26 : vector<4x256xf32>
    %28 = arith.mulf %27, %3 : vector<4x256xf32>
    %cst_34 = arith.constant dense<0.000000e+00> : vector<4xf32>
    %29 = vector.multi_reduction <add>, %3, %cst_34 [1] : vector<4x256xf32> to vector<4xf32>
    %30 = vector.shape_cast %29 : vector<4xf32> to vector<4x1xf32>
    %cst_35 = arith.constant 2.560000e+02 : f32
    %31 = vector.broadcast %cst_35 : f32 to vector<4x1xf32>
    %32 = arith.divf %30, %31 : vector<4x1xf32>
    %c0_36 = arith.constant 0 : index
    %c0_37 = arith.constant 0 : index
    %33 = vector.load %arg12[%c0_36, %c0_37] : memref<4x4xf32, #tpu.memory_space<vmem>>, vector<4x4xf32>
    %34 = tpu.transpose %32, [1, 0] : vector<4x1xf32> -> vector<1x4xf32>
    %35 = vector.broadcast %34 : vector<1x4xf32> to vector<4x4xf32>
    %36 = arith.mulf %33, %35 : vector<4x4xf32>
    %cst_38 = arith.constant dense<0.000000e+00> : vector<4xf32>
    %37 = vector.multi_reduction <add>, %36, %cst_38 [1] : vector<4x4xf32> to vector<4xf32>
    %38 = vector.shape_cast %37 : vector<4xf32> to vector<4x1xf32>
    %39 = arith.negf %38 : vector<4x1xf32>
    %40 = math.exp %39 : vector<4x1xf32>
    %cst_39 = arith.constant 1.000000e+00 : f32
    %41 = vector.broadcast %cst_39 : f32 to vector<4x1xf32>
    %42 = arith.addf %41, %40 : vector<4x1xf32>
    %43 = arith.divf %41, %42 : vector<4x1xf32>
    %cst_40 = arith.constant dense<0.000000e+00> : vector<256xf32>
    %44 = vector.multi_reduction <add>, %3, %cst_40 [0] : vector<4x256xf32> to vector<256xf32>
    %45 = vector.shape_cast %44 : vector<256xf32> to vector<1x256xf32>
    %cst_41 = arith.constant 4.000000e+00 : f32
    %46 = vector.broadcast %cst_41 : f32 to vector<1x256xf32>
    %47 = arith.divf %45, %46 : vector<1x256xf32>
    %48 = arith.negf %47 : vector<1x256xf32>
    %49 = math.exp %48 : vector<1x256xf32>
    %cst_42 = arith.constant 1.000000e+00 : f32
    %50 = vector.broadcast %cst_42 : f32 to vector<1x256xf32>
    %51 = arith.addf %50, %49 : vector<1x256xf32>
    %52 = arith.divf %50, %51 : vector<1x256xf32>
    %53 = vector.broadcast %43 : vector<4x1xf32> to vector<4x256xf32>
    %54 = arith.mulf %1, %53 : vector<4x256xf32>
    %55 = vector.broadcast %52 : vector<1x256xf32> to vector<4x256xf32>
    %56 = arith.mulf %54, %55 : vector<4x256xf32>
    %57 = arith.mulf %15, %13 : vector<4x256xf32>
    %58 = vector.extract_strided_slice %22 {offsets = [0, 0], sizes = [1, 1], strides = [1, 1]} : vector<4x1xf32> to vector<1x1xf32>
    %59 = vector.broadcast %58 : vector<1x1xf32> to vector<4x256xf32>
    %60 = arith.addf %57, %59 : vector<4x256xf32>
    %61 = arith.mulf %17, %1 : vector<4x256xf32>
    %62 = vector.extract_strided_slice %22 {offsets = [1, 0], sizes = [1, 1], strides = [1, 1]} : vector<4x1xf32> to vector<1x1xf32>
    %63 = vector.broadcast %62 : vector<1x1xf32> to vector<4x256xf32>
    %64 = arith.addf %61, %63 : vector<4x256xf32>
    %65 = arith.mulf %19, %1 : vector<4x256xf32>
    %66 = vector.extract_strided_slice %22 {offsets = [2, 0], sizes = [1, 1], strides = [1, 1]} : vector<4x1xf32> to vector<1x1xf32>
    %67 = vector.broadcast %66 : vector<1x1xf32> to vector<4x256xf32>
    %68 = arith.addf %65, %67 : vector<4x256xf32>
    %69 = arith.mulf %21, %11 : vector<4x256xf32>
    %70 = vector.extract_strided_slice %22 {offsets = [3, 0], sizes = [1, 1], strides = [1, 1]} : vector<4x1xf32> to vector<1x1xf32>
    %71 = vector.broadcast %70 : vector<1x1xf32> to vector<4x256xf32>
    %72 = arith.addf %69, %71 : vector<4x256xf32>
    %c0_43 = arith.constant 0 : index
    %c0_44 = arith.constant 0 : index
    %73 = vector.load %arg14[%c0_43, %c0_44] : memref<8x1xf32, #tpu.memory_space<vmem>>, vector<8x1xf32>
    %c0_45 = arith.constant 0 : index
    %c0_46 = arith.constant 0 : index
    %c0_47 = arith.constant 0 : index
    %74 = vector.load %arg13[%c0_45, %c0_46, %c0_47] : memref<10x8x4xf32, #tpu.memory_space<vmem>>, vector<1x8x4xf32>
    %75 = vector.shape_cast %74 : vector<1x8x4xf32> to vector<8x4xf32>
    %cst_48 = arith.constant dense<0.000000e+00> : vector<8x256xf32>
    %76 = tpu.matmul %75, %3, %cst_48 {dimension_numbers = #tpu.dot_dimension_numbers<[1], [0], [0], [1], [0, 0, 1, 1], [], []>} : vector<8x4xf32>, vector<4x256xf32>, vector<8x256xf32> -> vector<8x256xf32>
    %77 = vector.broadcast %73 : vector<8x1xf32> to vector<8x256xf32>
    %78 = arith.addf %77, %76 : vector<8x256xf32>
    %c1 = arith.constant 1 : index
    %c0_49 = arith.constant 0 : index
    %c0_50 = arith.constant 0 : index
    %79 = vector.load %arg13[%c1, %c0_49, %c0_50] : memref<10x8x4xf32, #tpu.memory_space<vmem>>, vector<1x8x4xf32>
    %80 = vector.shape_cast %79 : vector<1x8x4xf32> to vector<8x4xf32>
    %cst_51 = arith.constant dense<0.000000e+00> : vector<8x256xf32>
    %81 = tpu.matmul %80, %64, %cst_51 {dimension_numbers = #tpu.dot_dimension_numbers<[1], [0], [0], [1], [0, 0, 1, 1], [], []>} : vector<8x4xf32>, vector<4x256xf32>, vector<8x256xf32> -> vector<8x256xf32>
    %82 = arith.addf %78, %81 : vector<8x256xf32>
    %c2 = arith.constant 2 : index
    %c0_52 = arith.constant 0 : index
    %c0_53 = arith.constant 0 : index
    %83 = vector.load %arg13[%c2, %c0_52, %c0_53] : memref<10x8x4xf32, #tpu.memory_space<vmem>>, vector<1x8x4xf32>
    %84 = vector.shape_cast %83 : vector<1x8x4xf32> to vector<8x4xf32>
    %cst_54 = arith.constant dense<0.000000e+00> : vector<8x256xf32>
    %85 = tpu.matmul %84, %9, %cst_54 {dimension_numbers = #tpu.dot_dimension_numbers<[1], [0], [0], [1], [0, 0, 1, 1], [], []>} : vector<8x4xf32>, vector<4x256xf32>, vector<8x256xf32> -> vector<8x256xf32>
    %86 = arith.addf %82, %85 : vector<8x256xf32>
    %c3 = arith.constant 3 : index
    %c0_55 = arith.constant 0 : index
    %c0_56 = arith.constant 0 : index
    %87 = vector.load %arg13[%c3, %c0_55, %c0_56] : memref<10x8x4xf32, #tpu.memory_space<vmem>>, vector<1x8x4xf32>
    %88 = vector.shape_cast %87 : vector<1x8x4xf32> to vector<8x4xf32>
    %cst_57 = arith.constant dense<0.000000e+00> : vector<8x256xf32>
    %89 = tpu.matmul %88, %5, %cst_57 {dimension_numbers = #tpu.dot_dimension_numbers<[1], [0], [0], [1], [0, 0, 1, 1], [], []>} : vector<8x4xf32>, vector<4x256xf32>, vector<8x256xf32> -> vector<8x256xf32>
    %90 = arith.addf %86, %89 : vector<8x256xf32>
    %c4 = arith.constant 4 : index
    %c0_58 = arith.constant 0 : index
    %c0_59 = arith.constant 0 : index
    %91 = vector.load %arg13[%c4, %c0_58, %c0_59] : memref<10x8x4xf32, #tpu.memory_space<vmem>>, vector<1x8x4xf32>
    %92 = vector.shape_cast %91 : vector<1x8x4xf32> to vector<8x4xf32>
    %cst_60 = arith.constant dense<0.000000e+00> : vector<8x256xf32>
    %93 = tpu.matmul %92, %60, %cst_60 {dimension_numbers = #tpu.dot_dimension_numbers<[1], [0], [0], [1], [0, 0, 1, 1], [], []>} : vector<8x4xf32>, vector<4x256xf32>, vector<8x256xf32> -> vector<8x256xf32>
    %94 = arith.addf %90, %93 : vector<8x256xf32>
    %c5 = arith.constant 5 : index
    %c0_61 = arith.constant 0 : index
    %c0_62 = arith.constant 0 : index
    %95 = vector.load %arg13[%c5, %c0_61, %c0_62] : memref<10x8x4xf32, #tpu.memory_space<vmem>>, vector<1x8x4xf32>
    %96 = vector.shape_cast %95 : vector<1x8x4xf32> to vector<8x4xf32>
    %cst_63 = arith.constant dense<0.000000e+00> : vector<8x256xf32>
    %97 = tpu.matmul %96, %28, %cst_63 {dimension_numbers = #tpu.dot_dimension_numbers<[1], [0], [0], [1], [0, 0, 1, 1], [], []>} : vector<8x4xf32>, vector<4x256xf32>, vector<8x256xf32> -> vector<8x256xf32>
    %98 = arith.addf %94, %97 : vector<8x256xf32>
    %c6 = arith.constant 6 : index
    %c0_64 = arith.constant 0 : index
    %c0_65 = arith.constant 0 : index
    %99 = vector.load %arg13[%c6, %c0_64, %c0_65] : memref<10x8x4xf32, #tpu.memory_space<vmem>>, vector<1x8x4xf32>
    %100 = vector.shape_cast %99 : vector<1x8x4xf32> to vector<8x4xf32>
    %cst_66 = arith.constant dense<0.000000e+00> : vector<8x256xf32>
    %101 = tpu.matmul %100, %68, %cst_66 {dimension_numbers = #tpu.dot_dimension_numbers<[1], [0], [0], [1], [0, 0, 1, 1], [], []>} : vector<8x4xf32>, vector<4x256xf32>, vector<8x256xf32> -> vector<8x256xf32>
    %102 = arith.addf %98, %101 : vector<8x256xf32>
    %c7 = arith.constant 7 : index
    %c0_67 = arith.constant 0 : index
    %c0_68 = arith.constant 0 : index
    %103 = vector.load %arg13[%c7, %c0_67, %c0_68] : memref<10x8x4xf32, #tpu.memory_space<vmem>>, vector<1x8x4xf32>
    %104 = vector.shape_cast %103 : vector<1x8x4xf32> to vector<8x4xf32>
    %cst_69 = arith.constant dense<0.000000e+00> : vector<8x256xf32>
    %105 = tpu.matmul %104, %7, %cst_69 {dimension_numbers = #tpu.dot_dimension_numbers<[1], [0], [0], [1], [0, 0, 1, 1], [], []>} : vector<8x4xf32>, vector<4x256xf32>, vector<8x256xf32> -> vector<8x256xf32>
    %106 = arith.addf %102, %105 : vector<8x256xf32>
    %c8 = arith.constant 8 : index
    %c0_70 = arith.constant 0 : index
    %c0_71 = arith.constant 0 : index
    %107 = vector.load %arg13[%c8, %c0_70, %c0_71] : memref<10x8x4xf32, #tpu.memory_space<vmem>>, vector<1x8x4xf32>
    %108 = vector.shape_cast %107 : vector<1x8x4xf32> to vector<8x4xf32>
    %cst_72 = arith.constant dense<0.000000e+00> : vector<8x256xf32>
    %109 = tpu.matmul %108, %72, %cst_72 {dimension_numbers = #tpu.dot_dimension_numbers<[1], [0], [0], [1], [0, 0, 1, 1], [], []>} : vector<8x4xf32>, vector<4x256xf32>, vector<8x256xf32> -> vector<8x256xf32>
    %110 = arith.addf %106, %109 : vector<8x256xf32>
    %c9 = arith.constant 9 : index
    %c0_73 = arith.constant 0 : index
    %c0_74 = arith.constant 0 : index
    %111 = vector.load %arg13[%c9, %c0_73, %c0_74] : memref<10x8x4xf32, #tpu.memory_space<vmem>>, vector<1x8x4xf32>
    %112 = vector.shape_cast %111 : vector<1x8x4xf32> to vector<8x4xf32>
    %cst_75 = arith.constant dense<0.000000e+00> : vector<8x256xf32>
    %113 = tpu.matmul %112, %56, %cst_75 {dimension_numbers = #tpu.dot_dimension_numbers<[1], [0], [0], [1], [0, 0, 1, 1], [], []>} : vector<8x4xf32>, vector<4x256xf32>, vector<8x256xf32> -> vector<8x256xf32>
    %114 = arith.addf %110, %113 : vector<8x256xf32>
    %c0_76 = arith.constant 0 : index
    %c0_77 = arith.constant 0 : index
    %c0_78 = arith.constant 0 : index
    %115 = vector.load %arg16[%c0_76, %c0_77, %c0_78] : memref<1x8x256xf32, #tpu.memory_space<vmem>>, vector<1x8x256xf32>
    %116 = vector.shape_cast %115 : vector<1x8x256xf32> to vector<8x256xf32>
    %117 = vector.shape_cast %114 : vector<8x256xf32> to vector<1x8x256xf32>
    tpu.vector_store %arg16[%c0_76, %c0_77, %c0_78], %117 {strides = array<i32>} : memref<1x8x256xf32, #tpu.memory_space<vmem>>, vector<1x8x256xf32>,
    return
  }
  func.func @transform_0(%arg0: i32) -> (i32, i32, i32) {
    %c0_i32 = arith.constant 0 : i32
    %c0_i32_0 = arith.constant 0 : i32
    %c0_i32_1 = arith.constant 0 : i32
    return %arg0, %c0_i32, %c0_i32_0 : i32, i32, i32
  }
  func.func @transform_1(%arg0: i32) -> (i32, i32, i32) {
    %c0_i32 = arith.constant 0 : i32
    %c0_i32_0 = arith.constant 0 : i32
    %c0_i32_1 = arith.constant 0 : i32
    return %arg0, %c0_i32, %c0_i32_0 : i32, i32, i32
  }
  func.func @transform_2(%arg0: i32) -> (i32, i32, i32) {
    %c0_i32 = arith.constant 0 : i32
    %c0_i32_0 = arith.constant 0 : i32
    %c0_i32_1 = arith.constant 0 : i32
    return %arg0, %c0_i32, %c0_i32_0 : i32, i32, i32
  }
  func.func @transform_3(%arg0: i32) -> (i32, i32, i32) {
    %c0_i32 = arith.constant 0 : i32
    %c0_i32_0 = arith.constant 0 : i32
    %c0_i32_1 = arith.constant 0 : i32
    return %arg0, %c0_i32, %c0_i32_0 : i32, i32, i32
  }
  func.func @transform_4(%arg0: i32) -> (i32, i32, i32) {
    %c0_i32 = arith.constant 0 : i32
    %c0_i32_0 = arith.constant 0 : i32
    %c0_i32_1 = arith.constant 0 : i32
    return %arg0, %c0_i32, %c0_i32_0 : i32, i32, i32
  }
  func.func @transform_5(%arg0: i32) -> (i32, i32, i32) {
    %c0_i32 = arith.constant 0 : i32
    %c0_i32_0 = arith.constant 0 : i32
    %c0_i32_1 = arith.constant 0 : i32
    return %arg0, %c0_i32, %c0_i32_0 : i32, i32, i32
  }
  func.func @transform_6(%arg0: i32) -> (i32, i32, i32) {
    %c0_i32 = arith.constant 0 : i32
    %c0_i32_0 = arith.constant 0 : i32
    %c0_i32_1 = arith.constant 0 : i32
    return %arg0, %c0_i32, %c0_i32_0 : i32, i32, i32
  }
  func.func @transform_7(%arg0: i32) -> (i32, i32, i32) {
    %c0_i32 = arith.constant 0 : i32
    %c0_i32_0 = arith.constant 0 : i32
    %c0_i32_1 = arith.constant 0 : i32
    return %arg0, %c0_i32, %c0_i32_0 : i32, i32, i32
  }
  func.func @transform_8(%arg0: i32) -> (i32, i32, i32) {
    %c0_i32 = arith.constant 0 : i32
    %c0_i32_0 = arith.constant 0 : i32
    %c0_i32_1 = arith.constant 0 : i32
    return %arg0, %c0_i32, %c0_i32_0 : i32, i32, i32
  }
  func.func @transform_9(%arg0: i32) -> (i32, i32, i32) {
    %c0_i32 = arith.constant 0 : i32
    %c0_i32_0 = arith.constant 0 : i32
    %c0_i32_1 = arith.constant 0 : i32
    return %arg0, %c0_i32, %c0_i32_0 : i32, i32, i32
  }
  func.func @transform_10(%arg0: i32) -> (i32, i32, i32) {
    %c0_i32 = arith.constant 0 : i32
    %c0_i32_0 = arith.constant 0 : i32
    %c0_i32_1 = arith.constant 0 : i32
    return %arg0, %c0_i32, %c0_i32_0 : i32, i32, i32
  }
  func.func @transform_11(%arg0: i32) -> (i32, i32) {
    %c0_i32 = arith.constant 0 : i32
    %c0_i32_0 = arith.constant 0 : i32
    %c0_i32_1 = arith.constant 0 : i32
    return %c0_i32, %c0_i32_0 : i32, i32
  }
  func.func @transform_12(%arg0: i32) -> (i32, i32, i32) {
    %c0_i32 = arith.constant 0 : i32
    %c0_i32_0 = arith.constant 0 : i32
    %c0_i32_1 = arith.constant 0 : i32
    %c0_i32_2 = arith.constant 0 : i32
    return %c0_i32, %c0_i32_0, %c0_i32_1 : i32, i32, i32
  }
  func.func @transform_13(%arg0: i32) -> (i32, i32) {
    %c0_i32 = arith.constant 0 : i32
    %c0_i32_0 = arith.constant 0 : i32
    %c0_i32_1 = arith.constant 0 : i32
    return %c0_i32, %c0_i32_0 : i32, i32
  }
  func.func @transform_14(%arg0: i32) -> (i32, i32) {
    %c0_i32 = arith.constant 0 : i32
    %c0_i32_0 = arith.constant 0 : i32
    %c0_i32_1 = arith.constant 0 : i32
    return %c0_i32, %c0_i32_0 : i32, i32
  }
  func.func @transform_15(%arg0: i32) -> (i32, i32, i32) {
    %c0_i32 = arith.constant 0 : i32
    %c0_i32_0 = arith.constant 0 : i32
    %c0_i32_1 = arith.constant 0 : i32
    return %arg0, %c0_i32, %c0_i32_0 : i32, i32, i32
  }
}

</mosaic_0001>

<bundles_post_ra>
// kernel: fast_multi_branch_forward.4
= control target key start
LH: loop header
LB: loop body
LE: loop exit
PB: predicated region body
PF: predicated region fallthrough
CT: control target
= control target key end

     0   :  { %s1758_s21 = smov 0   ;;  %s1917_s0 = inlined_call_operand.vmem [shape: f32[2,64,16], index: 0, kind: input, shape index: {}]   ;;  %s1918_s1 = inlined_call_operand.vmem [shape: f32[2,64,16], index: 1, kind: input, shape index: {}]   ;;  %s1919_s2 = inlined_call_operand.vmem [shape: f32[2,64,16], index: 2, kind: input, shape index: {}]   ;;  %s1920_s3 = inlined_call_operand.vmem [shape: f32[2,64,16], index: 3, kind: input, shape index: {}]   ;;  %s1921_s4 = inlined_call_operand.vmem [shape: f32[2,64,16], index: 4, kind: output, shape index: {0}]   ;;  %s1922_s5 = inlined_call_operand.vmem [shape: f32[2,64,16], index: 5, kind: output, shape index: {1}]   ;;  %s1923_s6 = inlined_call_operand.vmem [shape: f32[2,64,16], index: 6, kind: output, shape index: {2}]  }
   0x1 LB: > { %s1475_s22 = sadd.s32 4294967295, %s1721_s21   ;;  %p1479_p0 = scmp.ge.s32.totalorder %s1721_s21, 1  ;;  %s1721_s21 = sphi %s1758_s21, %s17_s21  }
   0x2   : > { %p247_p1 = scmp.lt.s32.totalorder %s1721_s21, 3 }
   0x4   : > { %p248_p2 = pnand %p1479_p0, %p247_p1 }
   0x5   : > { %p302_p3 = scmp.lt.s32.totalorder (!%p248_p2), %s1475_s22, 1  ;;  %vm369_vm0 = vcmask (!%p248_p2), 130048  }
   0x6   : > { %251 = sbr.rel (%p248_p2) target bundleno = 258 (0x102), region = 36 }
   0xd   : > { %s1925_s22 = smov (!%p302_p3, %s1475_s22), 1 }
   0xe   : > { %s1766_s23 = sshll.u32 %s1925_s22, 6 }
   0xf   : > { %s1772_s26 = scalar_lea.vmem %s1918_s1, %s1766_s23  ;;  %s1778_s29 = scalar_lea.vmem %s1919_s2, %s1766_s23 }
  0x10   : > { %v345_v0 = vld [vmem:[%s1772_s26] sm:$0xff]  ;;  %v346_v1 = vld [vmem:[%s1772_s26 + $0x8] sm:$0xff]  ;;  %s1787_s8 = scalar_lea.vmem %s1917_s0, %s1766_s23  ;;  %s1793_s11 = scalar_lea.vmem %s1920_s3, %s1766_s23  ;;  %v347_v9 = vld [vmem:[%s1772_s26 + $0x10] sm:$0xff] }
  0x11   : > { %v353_v2 = vld [vmem:[%s1778_s29] sm:$0xff]  ;;  %v1659_v3 = vpack.c.bf16 %v346_v1, %v345_v0  ;;  %v354_v4 = vld [vmem:[%s1778_s29 + $0x8] sm:$0xff]  ;;  %v348_v12 = vld [vmem:[%s1772_s26 + $0x18] sm:$0xff]  ;;  %s1852_s14 = scalar_lea.vmem %s1921_s4, %s1766_s23  ;;  %s1858_s17 = scalar_lea.vmem %s1922_s5, %s1766_s23 }
  0x12   : > { %v337_v5 = vld [vmem:[%s1787_s8] sm:$0xff]  ;;  %v1663_v6 = vpack.c.bf16 %v354_v4, %v353_v2  ;;  %v362_v8 = vld [vmem:[%s1793_s11 + $0x8] sm:$0xff]  ;;  %v1671_v13 = vpack.c.bf16 %v348_v12, %v347_v9  ;;  %v355_v14 = vld [vmem:[%s1778_s29 + $0x10] sm:$0xff]  ;;  %s1870_s20 = scalar_lea.vmem %s1923_s6, %s1766_s23 }
  0x13   : > { %1579 = vmatprep.mubr.msk.f32.mxu0 %vm369_vm0, %v337_v5  ;;  %1586 = vmatprep.mubr.msk.f32.mxu1 %vm369_vm0, %v337_v5  ;;  %v361_v7 = vld [vmem:[%s1793_s11] sm:$0xff]  ;;  %v338_v10 = vld [vmem:[%s1787_s8 + $0x8] sm:$0xff]  ;;  %v356_v15 = vld [vmem:[%s1778_s29 + $0x18] sm:$0xff] }
  0x14   : > { %1660 = vmatprep.subr.bf16.mxu0 %v1659_v3  ;;  %v1667_v11 = vpack.c.bf16 %v362_v8, %v361_v7  ;;  %1664 = vmatprep.subr.bf16.mxu1 %v1663_v6  ;;  %v363_v16 = vld [vmem:[%s1793_s11 + $0x10] sm:$0xff]  ;;  %v364_v17 = vld [vmem:[%s1793_s11 + $0x18] sm:$0xff]  ;;  %v1675_v18 = vpack.c.bf16 %v356_v15, %v355_v14  ;;  %v349_v21 = vld [vmem:[%s1772_s26 + $0x20] sm:$0xff] }
  0x15   : > { %1662 = vmatpush3.bf16.msra.mxu0 %v1659_v3  ;;  %1666 = vmatpush3.bf16.msra.mxu1 %v1663_v6  ;;  %v339_v19 = vld [vmem:[%s1787_s8 + $0x10] sm:$0xff]  ;;  %v1679_v20 = vpack.c.bf16 %v364_v17, %v363_v16  ;;  %v350_v22 = vld [vmem:[%s1772_s26 + $0x28] sm:$0xff]  ;;  %v357_v23 = vld [vmem:[%s1778_s29 + $0x20] sm:$0xff] }
  0x16   : > { %1668 = vmatprep.subr.bf16.mxu0 %v1667_v11  ;;  %1672 = vmatprep.subr.bf16.mxu1 %v1671_v13  ;;  %v358_v24 = vld [vmem:[%s1778_s29 + $0x28] sm:$0xff]  ;;  %v340_v25 = vld [vmem:[%s1787_s8 + $0x18] sm:$0xff]  ;;  %v1683_v26 = vpack.c.bf16 %v350_v22, %v349_v21  ;;  %v365_v28 = vld [vmem:[%s1793_s11 + $0x20] sm:$0xff] }
  0x17   : > { %v1687_v27 = vpack.c.bf16 %v358_v24, %v357_v23  ;;  %v366_v29 = vld [vmem:[%s1793_s11 + $0x28] sm:$0xff]  ;;  %v351_v30 = vld [vmem:[%s1772_s26 + $0x30] sm:$0xff]  ;;  %v352_v31 = vld [vmem:[%s1772_s26 + $0x38] sm:$0xff] }
  0x18   : > { %1580 = vmatmul.mubr.msk.f32.vlgmr.msra.gmra.mrb[0].mxu0 %vm369_vm0, %v338_v10  ;;  %1587 = vmatmul.mubr.msk.f32.vlgmr.msra.gmra.mrb[0].mxu1 %vm369_vm0, %v338_v10  ;;  %v341_v32 = vld [vmem:[%s1787_s8 + $0x20] sm:$0xff]  ;;  %v1691_v33 = vpack.c.bf16 %v366_v29, %v365_v28  ;;  %v1695_v34 = vpack.c.bf16 %v352_v31, %v351_v30  ;;  %v359_v35 = vld [vmem:[%s1778_s29 + $0x30] sm:$0xff]  ;;  %v360_v36 = vld [vmem:[%s1778_s29 + $0x38] sm:$0xff] }
  0x19   : > { %1670 = vmatpush3.bf16.msra.mxu0 %v1667_v11  ;;  %1674 = vmatpush3.bf16.msra.mxu1 %v1671_v13  ;;  %v342_v37 = vld [vmem:[%s1787_s8 + $0x28] sm:$0xff]  ;;  %v367_v38 = vld [vmem:[%s1793_s11 + $0x30] sm:$0xff]  ;;  %v368_v39 = vld [vmem:[%s1793_s11 + $0x38] sm:$0xff]  ;;  %v1699_v40 = vpack.c.bf16 %v360_v36, %v359_v35 }
  0x1a   : > { %1593 = vmatprep.mubr.msk.f32.mxu0 %vm369_vm0, %v337_v5  ;;  %1600 = vmatprep.mubr.msk.f32.mxu1 %vm369_vm0, %v339_v19  ;;  %v343_v41 = vld [vmem:[%s1787_s8 + $0x30] sm:$0xff]  ;;  %v1703_v42 = vpack.c.bf16 %v368_v39, %v367_v38  ;;  %v344_v43 = vld [vmem:[%s1787_s8 + $0x38] sm:$0xff] }
  0x1b   : > { %1676 = vmatprep.subr.bf16.mxu0 %v1675_v18  ;;  %1680 = vmatprep.subr.bf16.mxu1 %v1679_v20 }
  0x1c   : > { %1594 = vmatmul.mubr.msk.f32.vlgmr.msra.gmra.mrb[2].mxu0 %vm369_vm0, %v338_v10  ;;  %1601 = vmatmul.mubr.msk.f32.vlgmr.msra.gmra.mrb[2].mxu1 %vm369_vm0, %v340_v25 }
  0x1d   : > { %1678 = vmatpush3.bf16.msra.mxu0 %v1675_v18  ;;  %1682 = vmatpush3.bf16.msra.mxu1 %v1679_v20 }
  0x1e   : > { %1607 = vmatprep.mubr.msk.f32.mxu0 %vm369_vm0, %v339_v19  ;;  %1614 = vmatprep.mubr.msk.f32.mxu1 %vm369_vm0, %v339_v19 }
  0x1f   : > { %1684 = vmatprep.subr.bf16.mxu0 %v1683_v26  ;;  %1688 = vmatprep.subr.bf16.mxu1 %v1687_v27 }
  0x20   : > { %1608 = vmatmul.mubr.msk.f32.vlgmr.msra.gmra.mrb[4].mxu0 %vm369_vm0, %v340_v25  ;;  %1615 = vmatmul.mubr.msk.f32.vlgmr.msra.gmra.mrb[4].mxu1 %vm369_vm0, %v340_v25 }
  0x21   : > { %1686 = vmatpush3.bf16.msra.mxu0 %v1683_v26  ;;  %1690 = vmatpush3.bf16.msra.mxu1 %v1687_v27 }
  0x22   : > { %1621 = vmatprep.mubr.msk.f32.mxu0 %vm369_vm0, %v341_v32  ;;  %1628 = vmatprep.mubr.msk.f32.mxu1 %vm369_vm0, %v341_v32 }
  0x23   : > { %1692 = vmatprep.subr.bf16.mxu0 %v1691_v33  ;;  %1696 = vmatprep.subr.bf16.mxu1 %v1695_v34 }
  0x24   : > { %1622 = vmatmul.mubr.msk.f32.vlgmr.msra.gmra.mrb[6].mxu0 %vm369_vm0, %v342_v37  ;;  %1629 = vmatmul.mubr.msk.f32.vlgmr.msra.gmra.mrb[6].mxu1 %vm369_vm0, %v342_v37 }
  0x25   : > { %1694 = vmatpush3.bf16.msra.mxu0 %v1691_v33  ;;  %1698 = vmatpush3.bf16.msra.mxu1 %v1695_v34 }
  0x26   : > { %1635 = vmatprep.mubr.msk.f32.mxu0 %vm369_vm0, %v341_v32  ;;  %1642 = vmatprep.mubr.msk.f32.mxu1 %vm369_vm0, %v343_v41 }
  0x27   : > { %1700 = vmatprep.subr.bf16.mxu0 %v1699_v40  ;;  %1704 = vmatprep.subr.bf16.mxu1 %v1703_v42 }
  0x28   : > { %1636 = vmatmul.mubr.msk.f32.vlgmr.msra.gmra.mrb[8].mxu0 %vm369_vm0, %v342_v37  ;;  %1643 = vmatmul.mubr.msk.f32.vlgmr.msra.gmra.mrb[8].mxu1 %vm369_vm0, %v344_v43 }
  0x29   : > { %1702 = vmatpush3.bf16.msra.mxu0 %v1699_v40  ;;  %1706 = vmatpush3.bf16.msra.mxu1 %v1703_v42 }
  0x2a   : > { %1649 = vmatprep.mubr.msk.f32.mxu0 %vm369_vm0, %v343_v41  ;;  %1656 = vmatprep.mubr.msk.f32.mxu1 %vm369_vm0, %v343_v41 }
  0x2c   : > { %1650 = vmatmul.mubr.msk.f32.vlgmr.msra.gmra.mrb[10].mxu0 %vm369_vm0, %v344_v43  ;;  %1657 = vmatmul.mubr.msk.f32.vlgmr.msra.gmra.mrb[10].mxu1 %vm369_vm0, %v344_v43 }
  0xeb   : > { %v1581_v44 = vpop.f32.mrb[0].mxu0  ;;  %v1588_v45 = vpop.f32.mrb[0].mxu1 }
  0xec   : > { %1295 = vst.msk [vmem:[%s1852_s14 + $0x8] sm:$0xff] %vm369_vm0, %v1581_v44  ;;  %v442_v46 = vpop.f32.mrb[1].mxu0  ;;  %1303 = vst.msk [vmem:[%s1858_s17 + $0x8] sm:$0xff] %vm369_vm0, %v1588_v45  ;;  %v517_v47 = vpop.f32.mrb[1].mxu1 }
  0xed   : > { %1294 = vst.msk [vmem:[%s1852_s14] sm:$0xff] %vm369_vm0, %v442_v46  ;;  %1302 = vst.msk [vmem:[%s1858_s17] sm:$0xff] %vm369_vm0, %v517_v47 }
  0xef   : > { %v1595_v48 = vpop.f32.mrb[2].mxu0  ;;  %v1602_v49 = vpop.f32.mrb[2].mxu1 }
  0xf0   : > { %1311 = vst.msk [vmem:[%s1870_s20 + $0x8] sm:$0xff] %vm369_vm0, %v1595_v48  ;;  %v592_v50 = vpop.f32.mrb[3].mxu0  ;;  %1297 = vst.msk [vmem:[%s1852_s14 + $0x18] sm:$0xff] %vm369_vm0, %v1602_v49  ;;  %v673_v51 = vpop.f32.mrb[3].mxu1 }
  0xf1   : > { %1310 = vst.msk [vmem:[%s1870_s20] sm:$0xff] %vm369_vm0, %v592_v50  ;;  %1296 = vst.msk [vmem:[%s1852_s14 + $0x10] sm:$0xff] %vm369_vm0, %v673_v51 }
  0xf3   : > { %v1609_v52 = vpop.f32.mrb[4].mxu0  ;;  %v1616_v53 = vpop.f32.mrb[4].mxu1 }
  0xf4   : > { %1305 = vst.msk [vmem:[%s1858_s17 + $0x18] sm:$0xff] %vm369_vm0, %v1609_v52  ;;  %v748_v54 = vpop.f32.mrb[5].mxu0  ;;  %1313 = vst.msk [vmem:[%s1870_s20 + $0x18] sm:$0xff] %vm369_vm0, %v1616_v53  ;;  %v823_v55 = vpop.f32.mrb[5].mxu1 }
  0xf5   : > { %1304 = vst.msk [vmem:[%s1858_s17 + $0x10] sm:$0xff] %vm369_vm0, %v748_v54  ;;  %1312 = vst.msk [vmem:[%s1870_s20 + $0x10] sm:$0xff] %vm369_vm0, %v823_v55 }
  0xf7   : > { %v1623_v56 = vpop.f32.mrb[6].mxu0  ;;  %v1630_v57 = vpop.f32.mrb[6].mxu1 }
  0xf8   : > { %1299 = vst.msk [vmem:[%s1852_s14 + $0x28] sm:$0xff] %vm369_vm0, %v1623_v56  ;;  %v904_v58 = vpop.f32.mrb[7].mxu0  ;;  %1307 = vst.msk [vmem:[%s1858_s17 + $0x28] sm:$0xff] %vm369_vm0, %v1630_v57  ;;  %v979_v59 = vpop.f32.mrb[7].mxu1 }
  0xf9   : > { %1298 = vst.msk [vmem:[%s1852_s14 + $0x20] sm:$0xff] %vm369_vm0, %v904_v58  ;;  %1306 = vst.msk [vmem:[%s1858_s17 + $0x20] sm:$0xff] %vm369_vm0, %v979_v59 }
  0xfb   : > { %v1637_v60 = vpop.f32.mrb[8].mxu0  ;;  %v1644_v61 = vpop.f32.mrb[8].mxu1 }
  0xfc   : > { %1315 = vst.msk [vmem:[%s1870_s20 + $0x28] sm:$0xff] %vm369_vm0, %v1637_v60  ;;  %v1054_v62 = vpop.f32.mrb[9].mxu0  ;;  %1301 = vst.msk [vmem:[%s1852_s14 + $0x38] sm:$0xff] %vm369_vm0, %v1644_v61  ;;  %v1135_v63 = vpop.f32.mrb[9].mxu1 }
  0xfd   : > { %1314 = vst.msk [vmem:[%s1870_s20 + $0x20] sm:$0xff] %vm369_vm0, %v1054_v62  ;;  %1300 = vst.msk [vmem:[%s1852_s14 + $0x30] sm:$0xff] %vm369_vm0, %v1135_v63 }
  0xff   : > { %v1651_v0 = vpop.f32.mrb[10].mxu0  ;;  %v1658_v1 = vpop.f32.mrb[10].mxu1 }
 0x100   : > { %1309 = vst.msk [vmem:[%s1858_s17 + $0x38] sm:$0xff] %vm369_vm0, %v1651_v0  ;;  %v1210_v2 = vpop.f32.mrb[11].mxu0  ;;  %1317 = vst.msk [vmem:[%s1870_s20 + $0x38] sm:$0xff] %vm369_vm0, %v1658_v1  ;;  %v1285_v3 = vpop.f32.mrb[11].mxu1 }
 0x101   : > { %1308 = vst.msk [vmem:[%s1858_s17 + $0x30] sm:$0xff] %vm369_vm0, %v1210_v2  ;;  %1316 = vst.msk [vmem:[%s1870_s20 + $0x30] sm:$0xff] %vm369_vm0, %v1285_v3 }
 0x102 PF: > { %s17_s21 = sadd.s32 1, %s1721_s21  }
 0x103   : > { %p14_p4 = scmp.ge.s32.totalorder %s17_s21, 4  }
 0x105   :  { %16 = sbr.rel (!%p14_p4) target bundleno = 1 (0x1), region = 99 }

// kernel: fast_multi_branch_forward.3
= control target key start
LH: loop header
LB: loop body
LE: loop exit
PB: predicated region body
PF: predicated region fallthrough
CT: control target
= control target key end

     0   :  { %s2138_s21 = smov 0   ;;  %s2347_s0 = inlined_call_operand.vmem [shape: f32[2,4,256], index: 0, kind: input, shape index: {}]   ;;  %s2348_s1 = inlined_call_operand.vmem [shape: f32[10,4,4], index: 1, kind: input, shape index: {}]   ;;  %s2349_s2 = inlined_call_operand.vmem [shape: f32[10,4,1], index: 2, kind: input, shape index: {}]   ;;  %s2350_s3 = inlined_call_operand.vmem [shape: f32[4,4], index: 3, kind: input, shape index: {}]   ;;  %s2351_s4 = inlined_call_operand.vmem [shape: f32[2,4,256], index: 4, kind: output, shape index: {0}]   ;;  %s2352_s5 = inlined_call_operand.vmem [shape: f32[2,4,256], index: 5, kind: output, shape index: {1}]   ;;  %s2353_s6 = inlined_call_operand.vmem [shape: f32[2,4,256], index: 6, kind: output, shape index: {2}]   ;;  %s2354_s7 = inlined_call_operand.vmem [shape: f32[2,4,256], index: 7, kind: output, shape index: {3}]   ;;  %s2355_s8 = inlined_call_operand.vmem [shape: f32[2,4,256], index: 8, kind: output, shape index: {4}]   ;;  %s2356_s9 = inlined_call_operand.vmem [shape: f32[2,4,256], index: 9, kind: output, shape index: {5}]   ;;  %s2357_s10 = inlined_call_operand.vmem [shape: f32[2,4,256], index: 10, kind: output, shape index: {6}]   ;;  %s2358_s11 = inlined_call_operand.vmem [shape: f32[2,4,256], index: 11, kind: output, shape index: {7}]   ;;  %s2359_s12 = inlined_call_operand.vmem [shape: f32[2,4,256], index: 12, kind: output, shape index: {8}]  }
   0x1 LB: > { %s1914_s22 = sadd.s32 4294967295, %s2068_s21   ;;  %p1918_p0 = scmp.ge.s32.totalorder %s2068_s21, 1  ;;  %s2068_s21 = sphi %s2138_s21, %s23_s21  }
   0x2   : > { %p379_p1 = scmp.lt.s32.totalorder %s2068_s21, 3 }
   0x4   : > { %p380_p2 = pnand %p1918_p0, %p379_p1 }
   0x5   : > { %v513_v0 = vld [vmem:[%s2349_s2] sm:$0xf] (!%p380_p2)  ;;  %p461_p3 = scmp.lt.s32.totalorder (!%p380_p2), %s1914_s22, 1  ;;  %v2070_v1 = vmov (!%p380_p2), 0   ;;  %v2071_v2 = vmov (!%p380_p2), 0.0   ;;  %vm525_vm0 = vcmask (!%p380_p2), 1043456   ;;  %v1114_v35 = vlaneseq (!%p380_p2) }
   0x6   : > { %383 = sbr.rel (%p380_p2) target bundleno = 1147 (0x47b), region = 36  ;;  %2017 = vset.pattern.permute.xlu0 (!%p380_p2), %v2070_v1  ;;  %594 = vmatprep.mubr.f32.mxu0 (!%p380_p2), %v2071_v2  ;;  %v512_v5 = vld [vmem:[%s2348_s1] sm:$0xf] (!%p380_p2)  ;;  %vm521_vm1 = vcmask (!%p380_p2), 31744   ;;  %v1969_v9 = vld [vmem:[%s2349_s2 + $0x14] sm:$0xf] (!%p380_p2) }
   0x7   : > { %516 = vperm.xlu0 (!%p380_p2), %2017, %v513_v0   ;;  %700 = vmatprep.mubr.f32.mxu1 (!%p380_p2), %v2071_v2  ;;  %v1950_v10 = vld [vmem:[%s2349_s2 + $0x8] sm:$0xf] (!%p380_p2)  ;;  %v1945_v11 = vld [vmem:[%s2349_s2 + $0x4] sm:$0xf] (!%p380_p2)  ;;  %v1957_v12 = vld [vmem:[%s2349_s2 + $0xc] sm:$0xf] (!%p380_p2) }
   0x8   : > { %v1944_v31 = vld [vmem:[%s2348_s1 + $0x4] sm:$0xf] (!%p380_p2)  ;;  %v1949_v32 = vld [vmem:[%s2348_s1 + $0x8] sm:$0xf] (!%p380_p2)  ;;  %v1956_v33 = vld [vmem:[%s2348_s1 + $0xc] sm:$0xf] (!%p380_p2) }
   0x9   : > { %v1968_v34 = vld [vmem:[%s2348_s1 + $0x14] sm:$0xf] (!%p380_p2)  ;;  %v1115_v36 = vshrl.u32 (!%p380_p2), %v1114_v35, 7  ;;  %v1081_v39 = vld [vmem:[%s2350_s3] sm:$0xf] (!%p380_p2)  ;;  %vm1119_vm2 = vcmask (!%p380_p2), 27648  }
   0xa   : > { %v1961_v43 = vld [vmem:[%s2348_s1 + $0x10] sm:$0xf] (!%p380_p2)  ;;  %v2072_v49 = vmov (!%p380_p2), 839922192  }
   0xb   : > { %v1116_v37 = vsub.s32 (!%p380_p2), 0, %v1115_v36  ;;  %v1131_v50 = vunpack.c.l.s4 (!%p380_p2), %v2072_v49  ;;  %v1962_v49 = vld [vmem:[%s2349_s2 + $0x10] sm:$0xf] (!%p380_p2) }
   0xd   : > { %s2361_s22 = smov (!%p461_p3, %s1914_s22), 1  ;;  %v1132_v52 = vunpack.c.0.s8 %v1131_v50 }
   0xe   : > { %s2151_s25 = sshll.u32 %s2361_s22, 3 }
   0xf   : > { %s465_s28 = scalar_lea.vmem %s2347_s0, %s2151_s25  ;;  %s470_s24 = scalar_lea.vmem %s2351_s4, %s2151_s25  ;;  %v2245_v60 = vsub.s32 %v1132_v52, %v1115_v36 }
  0x10   : > { %v2157_v3 = vld [vmem:[%s465_s28] sm:$0xff]  ;;  %s475_s28 = scalar_lea.vmem %s2352_s5, %s2151_s25  ;;  %s490_s13 = scalar_lea.vmem %s2355_s8, %s2151_s25 }
  0x11   : > { %v2161_v4 = vcombine.high %v2157_v3, %v2157_v3  ;;  %v1074_v6 = vsel %vm525_vm0, %v2157_v3, 0.0  ;;  %s485_s16 = scalar_lea.vmem %s2354_s7, %s2151_s25  ;;  %s495_s15 = scalar_lea.vmem %s2356_s9, %s2151_s25 }
  0x12   : > { %s505_s20 = scalar_lea.vmem %s2358_s11, %s2151_s25 }
  0x13   : > { %1939 = vmatprep.subr.msk.mxu0 %vm525_vm0, %v2161_v4  ;;  %v1075_v7 = vsel %vm525_vm0, %v2161_v4, 0.0 }
  0x14   : > { %1940 = vmatpush1.msk.msra.mxu0 %vm525_vm0, %v2157_v3  ;;  %v1076_v8 = vadd.f32 %v1075_v7, %v1074_v6 }
  0x15   : > { %1941 = vmatmul.mubr.msk.f32.vlgmr.msra.gmra.mrb[0].mxu0 %vm521_vm1, %v512_v5 }
  0x16   : > { %785 = vmatprep.mubr.f32.mxu0 %v2071_v2 }
  0x26   : > { %1077 = vadd.xlane.f32.xlu0 %v1076_v8 }
  0x3c   : > { %996 = vperm.xlu0 %2017, %v1969_v9  }
  0x40   : > { %715 = vperm.xlu0 %2017, %v1950_v10  }
  0x44   : > { %624 = vperm.xlu0 %2017, %v1945_v11  }
  0x48   : > { %812 = vperm.xlu0 %2017, %v1957_v12  }
  0x86   : > { %v517_v13 = vpop.permute.xlu0 %516 }
  0xb3   : > { %v1078_v14 = vpop.xlane.xlu0 %1077 }
  0xb4   : > { %v1080_v15 = vmul.f32 0.00390625, %v1078_v14 }
  0xb6   : > { %1082 = vxpose.xlu1.b32.start.end [1/1] (short) (narrow) %v1080_v15, 8 }
  0xbb   : > { %v997_v46 = vpop.permute.xlu0 %996 }
  0xbf   : > { %v716_v51 = vpop.permute.xlu0 %715 }
  0xc3   : > { %v625_v8 = vpop.permute.xlu0 %624 }
  0xd4   : > { %2018 = vset.pattern.permute.xlu1 %v2070_v1 }
  0xe8   : > { %v596_v16 = vpop.f32.mrb[0].mxu0 }
  0xe9   : > { %v597_v17 = vadd.f32 %v596_v16, %v517_v13  ;;  %v598_v18 = vpop.f32.mrb[1].mxu0 }
  0xea   : > { %v599_v19 = vadd.f32 %v598_v18, %v517_v13 }
  0xeb   : > { %v1942_v20 = vmul.f32 -1.442695, %v597_v17 }
  0xec   : > { %v1943_v21 = vmul.f32 -1.442695, %v599_v19 }
  0xed   : > { %2020 = vpow2.f32 %v1942_v20 }
  0xee   : > { %2022 = vpow2.f32 %v1943_v21 }
  0xf7   : > { %v2021_v22 = vpop.eup %2020 }
  0xf8   : > { %v2023_v23 = vpop.eup %2022  ;;  %v607_v24 = vadd.f32 1.0, %v2021_v22 }
  0xf9   : > { %v608_v25 = vadd.f32 1.0, %v2023_v23 }
  0xfa   : > { %2024 = vrcp.f32 %v607_v24 }
  0xfb   : > { %2026 = vrcp.f32 %v608_v25 }
 0x104   : > { %v2025_v26 = vpop.eup %2024 }
 0x105   : > { %v2027_v27 = vpop.eup %2026 }
 0x106   : > { %v615_v28 = vcombine.low %v2025_v26, %v2027_v27 }
 0x108   : > { %v617_v29 = vmul.f32 %v615_v28, %v2157_v3  ;;  %1220 = vst [vmem:[%s470_s24] sm:$0xff] %v615_v28  ;;  %s510_s24 = scalar_lea.vmem %s2359_s12, %s2151_s25 }
 0x10a   : > { %v628_v30 = vcombine.high %v617_v29, %v617_v29  ;;  %1221 = vst [vmem:[%s475_s28] sm:$0xff] %v617_v29  ;;  %s500_s28 = scalar_lea.vmem %s2357_s10, %s2151_s25 }
 0x10c   : > { %1946 = vmatprep.subr.msk.mxu1 %vm525_vm0, %v628_v30  ;;  %1951 = vmatprep.subr.msk.mxu0 %vm525_vm0, %v628_v30  ;;  %v1974_v30 = vld [vmem:[%s2348_s1 + $0x18] sm:$0xf] }
 0x10d   : > { %1947 = vmatpush1.msk.msra.mxu1 %vm525_vm0, %v617_v29  ;;  %1952 = vmatpush1.msk.msra.mxu0 %vm525_vm0, %v617_v29 }
 0x10e   : > { %1948 = vmatmul.mubr.msk.f32.vlgmr.msra.gmra.mrb[0].mxu1 %vm521_vm1, %v1944_v31  ;;  %1953 = vmatmul.mubr.msk.f32.vlgmr.msra.gmra.mrb[2].mxu0 %vm521_vm1, %v1949_v32 }
 0x10f   : > { %1958 = vmatprep.subr.msk.mxu1 %vm525_vm0, %v2161_v4  ;;  %882 = vmatprep.mubr.f32.mxu1 %v2071_v2 }
 0x110   : > { %1959 = vmatpush1.msk.msra.mxu1 %vm525_vm0, %v2157_v3  ;;  %1963 = vmatprep.subr.msk.mxu0 %vm525_vm0, %v2161_v4 }
 0x111   : > { %1970 = vmatprep.subr.msk.mxu1 %vm525_vm0, %v2161_v4  ;;  %1964 = vmatpush1.msk.msra.mxu0 %vm525_vm0, %v2157_v3 }
 0x112   : > { %1960 = vmatmul.mubr.msk.f32.vlgmr.msra.gmra.mrb[2].mxu1 %vm521_vm1, %v1956_v33  ;;  %967 = vmatprep.mubr.f32.mxu0 %v2071_v2 }
 0x113   : > { %1971 = vmatpush1.msk.msra.mxu1 %vm525_vm0, %v2157_v3  ;;  %1066 = vmatprep.mubr.f32.mxu1 %v2071_v2 }
 0x114   : > { %1976 = vmatprep.subr.msk.mxu0 %vm525_vm0, %v2161_v4  ;;  %1965 = vmatmul.mubr.msk.f32.vlgmr.msra.gmra.mrb[4].mxu0 %vm521_vm1, %v1961_v43 }
 0x115   : > { %1977 = vmatpush1.msk.msra.mxu0 %vm525_vm0, %v2157_v3  ;;  %1309 = vmatprep.mubr.f32.mxu0 %v2071_v2 }
 0x116   : > { %1972 = vmatmul.mubr.msk.f32.vlgmr.msra.gmra.mrb[4].mxu1 %vm521_vm1, %v1968_v34 }
 0x117   : > { %1403 = vmatprep.mubr.f32.mxu1 %v2071_v2 }
 0x118   : > { %1978 = vmatmul.mubr.msk.f32.vlgmr.msra.gmra.mrb[6].mxu0 %vm521_vm1, %v1974_v30 }
 0x119   : > { %1495 = vmatprep.mubr.f32.mxu0 %v2071_v2 }
 0x136   : > { %v1098_v38 = vpop.trf.xlu1 }
 0x137   : > { %v1117_v40 = vrot.slane %v1098_v38, %v1116_v37 }
 0x139   : > { %v1118_v41 = vmul.f32 %v1117_v40, %v1081_v39 }
 0x13b   : > { %v1120_v42 = vsel %vm1119_vm2, %v1118_v41, 0.0 }
 0x13c   : > { %1121 = vadd.xlane.f32.xlu1 %v1120_v42 }
 0x1c9   : > { %v1122_v44 = vpop.xlane.xlu1 %1121 }
 0x1ca   : > { %v1973_v45 = vmul.f32 -1.442695, %v1122_v44 }
 0x1cc   : > { %2028 = vpow2.f32 %v1973_v45 }
 0x1d6   : > { %v2029_v47 = vpop.eup %2028 }
 0x1d7   : > { %v1126_v48 = vadd.f32 1.0, %v2029_v47 }
 0x1d9   : > { %2030 = vrcp.f32 %v1126_v48 }
 0x1e1   : > { %v702_v53 = vpop.f32.mrb[0].mxu1  ;;  %v787_v54 = vpop.f32.mrb[2].mxu0 }
 0x1e2   : > { %v788_v55 = vadd.f32 %v787_v54, %v716_v51  ;;  %v704_v56 = vpop.f32.mrb[1].mxu1  ;;  %v789_v57 = vpop.f32.mrb[3].mxu0  ;;  %v703_v9 = vadd.f32 %v702_v53, %v625_v8 }
 0x1e3   : > { %v790_v58 = vadd.f32 %v789_v57, %v716_v51  ;;  %v2031_v0 = vpop.eup %2030  ;;  %v705_v13 = vadd.f32 %v704_v56, %v625_v8 }
 0x1e4   : > { %v1954_v59 = vmul.f32 -1.442695, %v788_v55  ;;  %v1136_v5 = vrot.slane %v2031_v0, %v2245_v60 }
 0x1e5   : > { %v1955_v61 = vmul.f32 -1.442695, %v790_v58  ;;  %v2247_v62 = vpop.f32.mrb[2].mxu1 }
 0x1e6   : > { %2032 = vpow2.f32 %v1954_v59  ;;  %v2249_v63 = vpop.f32.mrb[3].mxu1  ;;  %v1138_v7 = vmul.f32 %v1136_v5, %v2157_v3 }
 0x1e7   : > { %2034 = vpow2.f32 %v1955_v61  ;;  %v969_v50 = vpop.f32.mrb[4].mxu0 }
 0x1e8   : > { %v1180_v12 = vcombine.high %v1138_v7, %v1138_v7  ;;  %v1182_v14 = vsel %vm525_vm0, %v1138_v7, 0.0  ;;  %2036 = vtanh.f32 %v703_v9  ;;  %v971_v51 = vpop.f32.mrb[5].mxu0  ;;  %v813_v9 = vpop.permute.xlu0 %812 }
 0x1e9   : > { %v1068_v1 = vpop.f32.mrb[4].mxu1  ;;  %2038 = vtanh.f32 %v705_v13 }
 0x1ea   : > { %v1070_v6 = vpop.f32.mrb[5].mxu1  ;;  %v1069_v10 = vadd.f32 %v1068_v1, %v997_v46  ;;  %v1183_v15 = vsel %vm525_vm0, %v1180_v12, 0.0 }
 0x1eb   : > { %v1071_v11 = vadd.f32 %v1070_v6, %v997_v46  ;;  %v1184_v17 = vadd.f32 %v1183_v15, %v1182_v14  ;;  %v887_v14 = vadd.f32 %v2249_v63, %v813_v9  ;;  %v1984_v15 = vld [vmem:[%s2348_s1 + $0x20] sm:$0xf] }
 0x1ec   : > { %v1159_v20 = vsel %vm525_vm0, %v1069_v10, 0.0 }
 0x1ed   : > { %v1160_v21 = vsel %vm525_vm0, %v1071_v11, 0.0  ;;  %1185 = vadd.xlane.f32.xlu1 %v1184_v17 }
 0x1ee   : > { %v1161_v23 = vadd.f32 %v1160_v21, %v1159_v20 }
 0x1f0   : > { %v2033_v16 = vpop.eup %2032 }
 0x1f1   : > { %v2035_v18 = vpop.eup %2034  ;;  %v798_v19 = vadd.f32 1.0, %v2033_v16  ;;  %1162 = vadd.xlane.f32.xlu1 %v1161_v23 }
 0x1f2   : > { %v799_v22 = vadd.f32 1.0, %v2035_v18  ;;  %v2037_v24 = vpop.eup %2036 }
 0x1f3   : > { %2040 = vrcp.f32 %v798_v19  ;;  %v2039_v25 = vpop.eup %2038  ;;  %v1989_v19 = vld [vmem:[%s2348_s1 + $0x24] sm:$0xf] }
 0x1f4   : > { %2042 = vrcp.f32 %v799_v22 }
 0x1fd   : > { %v2041_v26 = vpop.eup %2040 }
 0x1fe   : > { %v2043_v27 = vpop.eup %2042  ;;  %v2257_v28 = vmul.f32 %v2041_v26, %v2037_v24 }
 0x1ff   : > { %v2259_v29 = vmul.f32 %v2043_v27, %v2039_v25 }
 0x27a   : > { %v1186_v31 = vpop.xlane.xlu1 %1185 }
 0x27b   : > { %v1187_v32 = vmul.f32 0.00390625, %v1186_v31 }
 0x27d   : > { %v1195_v33 = vrot.slane %v1187_v32, %v2245_v60  ;;  %v1975_v32 = vld [vmem:[%s2349_s2 + $0x18] sm:$0xf] }
 0x27e   : > { %v1163_v34 = vpop.xlane.xlu1 %1162 }
 0x27f   : > { %v1197_v35 = vsub.f32 %v1138_v7, %v1195_v33  ;;  %v1164_v36 = vmul.f32 0.00390625, %v1163_v34  ;;  %v1985_v33 = vld [vmem:[%s2349_s2 + $0x20] sm:$0xf] }
 0x281   : > { %v1165_v37 = vsub.f32 %v1069_v10, %v1164_v36  ;;  %v1166_v38 = vsub.f32 %v1071_v11, %v1164_v36  ;;  %v1198_v39 = vmul.f32 %v1197_v35, %v1197_v35  ;;  %v885_v10 = vadd.f32 %v2247_v62, %v813_v9 }
 0x283   : > { %v1200_v40 = vcombine.high %v1198_v39, %v1198_v39  ;;  %v1167_v41 = vmul.f32 %v1165_v37, %v1165_v37  ;;  %v1168_v42 = vmul.f32 %v1166_v38, %v1166_v38  ;;  %v1202_v43 = vsel %vm525_vm0, %v1198_v39, 0.0 }
 0x285   : > { %v1203_v44 = vsel %vm525_vm0, %v1200_v40, 0.0  ;;  %v1169_v46 = vsel %vm525_vm0, %v1167_v41, 0.0  ;;  %v1170_v47 = vsel %vm525_vm0, %v1168_v42, 0.0 }
 0x286   : > { %v1204_v45 = vadd.f32 %v1203_v44, %v1202_v43  ;;  %v1171_v48 = vadd.f32 %v1170_v47, %v1169_v46  ;;  %v1980_v46 = vld [vmem:[%s2349_s2 + $0x1c] sm:$0xf] }
 0x288   : > { %1205 = vadd.xlane.f32.xlu1 %v1204_v45 }
 0x28c   : > { %1172 = vadd.xlane.f32.xlu1 %v1171_v48 }
 0x29d   : > { %897 = vperm.xlu1 %2018, %v1962_v49  }
 0x315   : > { %v1206_v52 = vpop.xlane.xlu1 %1205 }
 0x316   : > { %v1207_v53 = vmul.f32 0.00390625, %v1206_v52 }
 0x318   : > { %v1208_v54 = vadd.f32 1e-05, %v1207_v53 }
 0x319   : > { %v1173_v55 = vpop.xlane.xlu1 %1172 }
 0x31a   : > { %2044 = vrsqrt.f32 %v1208_v54  ;;  %v1174_v56 = vmul.f32 0.00390625, %v1173_v55 }
 0x31c   : > { %v1175_v57 = vadd.f32 1e-05, %v1174_v56 }
 0x31d   : > { %v898_v58 = vpop.permute.xlu1 %897 }
 0x31e   : > { %2046 = vrsqrt.f32 %v1175_v57  ;;  %v970_v59 = vadd.f32 %v969_v50, %v898_v58  ;;  %v972_v61 = vadd.f32 %v971_v51, %v898_v58 }
 0x320   : > { %v1966_v0 = vmul.f32 -1.442695, %v970_v59  ;;  %v1967_v1 = vmul.f32 -1.442695, %v972_v61 }
 0x322   : > { %2048 = vpow2.f32 %v1966_v0 }
 0x323   : > { %2050 = vpow2.f32 %v1967_v1 }
 0x324   : > { %v2045_v5 = vpop.eup %2044  ;;  %2052 = vtanh.f32 %v885_v10 }
 0x325   : > { %v1217_v6 = vrot.slane %v2045_v5, %v2245_v60  ;;  %v1979_v60 = vld [vmem:[%s2348_s1 + $0x1c] sm:$0xf]  ;;  %2054 = vtanh.f32 %v887_v14 }
 0x327   : > { %v1219_v7 = vmul.f32 %v1217_v6, %v1197_v35 }
 0x328   : > { %v2047_v8 = vpop.eup %2046 }
 0x329   : > { %1232 = vst [vmem:[%s490_s13] sm:$0xff] %v1219_v7  ;;  %v1331_v11 = vcombine.high %v1219_v7, %v1219_v7  ;;  %v1177_v12 = vmul.f32 %v2047_v8, %v1165_v37  ;;  %v1178_v13 = vmul.f32 %v2047_v8, %v1166_v38  ;;  %s480_s13 = scalar_lea.vmem %s2353_s6, %s2151_s25 }
 0x32b   : > { %1981 = vmatprep.subr.msk.mxu1 %vm525_vm0, %v1331_v11  ;;  %v1229_v62 = vcombine.low %v1177_v12, %v1178_v13  ;;  %1986 = vmatprep.subr.msk.mxu0 %vm525_vm0, %v1178_v13 }
 0x32c   : > { %v2049_v16 = vpop.eup %2048  ;;  %1982 = vmatpush1.msk.msra.mxu1 %vm525_vm0, %v1219_v7  ;;  %1987 = vmatpush1.msk.msra.mxu0 %vm525_vm0, %v1177_v12 }
 0x32d   : > { %v2051_v63 = vpop.eup %2050  ;;  %v980_v17 = vadd.f32 1.0, %v2049_v16  ;;  %1231 = vst [vmem:[%s485_s16] sm:$0xff] %v1229_v62  ;;  %1983 = vmatmul.mubr.msk.f32.vlgmr.msra.gmra.mrb[6].mxu1 %vm521_vm1, %v1979_v60  ;;  %1988 = vmatmul.mubr.msk.f32.vlgmr.msra.gmra.mrb[8].mxu0 %vm521_vm1, %v1984_v15 }
 0x32e   : > { %v981_v18 = vadd.f32 1.0, %v2051_v63  ;;  %1991 = vmatprep.subr.msk.mxu1 %vm525_vm0, %v2161_v4  ;;  %1583 = vmatprep.mubr.f32.mxu1 %v2071_v2  ;;  %v2053_v20 = vpop.eup %2052 }
 0x32f   : > { %2056 = vrcp.f32 %v980_v17  ;;  %1992 = vmatpush1.msk.msra.mxu1 %vm525_vm0, %v2157_v3  ;;  %v2055_v21 = vpop.eup %2054  ;;  %v1311_v3 = vpop.f32.mrb[6].mxu0 }
 0x330   : > { %2058 = vrcp.f32 %v981_v18  ;;  %v1313_v31 = vpop.f32.mrb[7].mxu0 }
 0x331   : > { %1993 = vmatmul.mubr.msk.f32.vlgmr.msra.gmra.mrb[8].mxu1 %vm521_vm1, %v1989_v19 }
 0x339   : > { %v2057_v22 = vpop.eup %2056 }
 0x33a   : > { %v2059_v23 = vpop.eup %2058  ;;  %v986_v24 = vmul.f32 %v2057_v22, %v2053_v20 }
 0x33b   : > { %v987_v25 = vmul.f32 %v2059_v23, %v2055_v21 }
 0x33c   : > { %v988_v4 = vadd.f32 %v986_v24, %v2257_v28  ;;  %v1990_v28 = vld [vmem:[%s2349_s2 + $0x24] sm:$0xf] }
 0x33d   : > { %v989_v2 = vadd.f32 %v987_v25, %v2259_v29 }
 0x33e   : > { %v1139_v26 = vsel %vm525_vm0, %v988_v4, 0.0 }
 0x33f   : > { %v1140_v27 = vsel %vm525_vm0, %v989_v2, 0.0 }
 0x340   : > { %v1141_v30 = vadd.f32 %v1140_v27, %v1139_v26 }
 0x342   : > { %1142 = vadd.xlane.f32.xlu0 %v1141_v30 }
 0x358   : > { %1239 = vperm.xlu0 %2017, %v1975_v32  }
 0x35c   : > { %1421 = vperm.xlu0 %2017, %v1985_v33  }
 0x360   : > { %1513 = vperm.xlu0 %2017, %v1990_v28  }
 0x3cf   : > { %v1143_v29 = vpop.xlane.xlu0 %1142 }
 0x3d0   : > { %v1144_v34 = vmul.f32 0.00390625, %v1143_v29 }
 0x3d2   : > { %v1145_v35 = vsub.f32 %v988_v4, %v1144_v34  ;;  %v1146_v36 = vsub.f32 %v989_v2, %v1144_v34 }
 0x3d4   : > { %v1147_v37 = vmul.f32 %v1145_v35, %v1145_v35  ;;  %v1148_v38 = vmul.f32 %v1146_v36, %v1146_v36 }
 0x3d6   : > { %v1149_v39 = vsel %vm525_vm0, %v1147_v37, 0.0  ;;  %v1150_v40 = vsel %vm525_vm0, %v1148_v38, 0.0 }
 0x3d7   : > { %v1240_v41 = vpop.permute.xlu0 %1239  ;;  %v1151_v42 = vadd.f32 %v1150_v40, %v1149_v39 }
 0x3d8   : > { %v1312_v43 = vadd.f32 %v1311_v3, %v1240_v41  ;;  %v1314_v44 = vadd.f32 %v1313_v31, %v1240_v41 }
 0x3d9   : > { %1152 = vadd.xlane.f32.xlu1 %v1151_v42 }
 0x3da   : > { %v1318_v45 = vcombine.low %v1312_v43, %v1314_v44 }
 0x3db   : > { %v1422_v47 = vpop.permute.xlu0 %1421 }
 0x3dc   : > { %1320 = vst [vmem:[%s495_s15] sm:$0xff] %v1318_v45 }
 0x3df   : > { %v1514_v54 = vpop.permute.xlu0 %1513 }
 0x3ea   : > { %1327 = vperm.xlu1 %2018, %v1980_v46  }
 0x400   : > { %v1497_v48 = vpop.f32.mrb[8].mxu0  ;;  %v1405_v49 = vpop.f32.mrb[6].mxu1 }
 0x401   : > { %v1498_v50 = vadd.f32 %v1497_v48, %v1422_v47  ;;  %v1499_v51 = vpop.f32.mrb[9].mxu0  ;;  %v1407_v52 = vpop.f32.mrb[7].mxu1 }
 0x402   : > { %v1500_v53 = vadd.f32 %v1499_v51, %v1422_v47 }
 0x404   : > { %v1504_v55 = vcombine.low %v1498_v50, %v1500_v53  ;;  %v1585_v56 = vpop.f32.mrb[8].mxu1 }
 0x405   : > { %v1586_v57 = vadd.f32 %v1585_v56, %v1514_v54  ;;  %v1587_v58 = vpop.f32.mrb[9].mxu1 }
 0x406   : > { %1506 = vst [vmem:[%s505_s20] sm:$0xff] %v1504_v55  ;;  %v1588_v59 = vadd.f32 %v1587_v58, %v1514_v54 }
 0x408   : > { %v1592_v61 = vcombine.low %v1586_v57, %v1588_v59 }
 0x40a   : > { %1594 = vst [vmem:[%s510_s24] sm:$0xff] %v1592_v61 }
 0x466   : > { %v1153_v0 = vpop.xlane.xlu1 %1152 }
 0x467   : > { %v1154_v1 = vmul.f32 0.00390625, %v1153_v0 }
 0x469   : > { %v1155_v5 = vadd.f32 1e-05, %v1154_v1 }
 0x46a   : > { %v1328_v6 = vpop.permute.xlu1 %1327 }
 0x46b   : > { %2060 = vrsqrt.f32 %v1155_v5  ;;  %v1406_v7 = vadd.f32 %v1405_v49, %v1328_v6  ;;  %v1408_v8 = vadd.f32 %v1407_v52, %v1328_v6 }
 0x46d   : > { %v1412_v9 = vcombine.low %v1406_v7, %v1408_v8 }
 0x46f   : > { %1414 = vst [vmem:[%s500_s28] sm:$0xff] %v1412_v9 }
 0x475   : > { %v2061_v10 = vpop.eup %2060 }
 0x476   : > { %v1157_v11 = vmul.f32 %v2061_v10, %v1145_v35  ;;  %v1158_v12 = vmul.f32 %v2061_v10, %v1146_v36 }
 0x478   : > { %v1224_v13 = vcombine.low %v1157_v11, %v1158_v12 }
 0x47a   : > { %1226 = vst [vmem:[%s480_s13] sm:$0xff] %v1224_v13 }
 0x47b PF: > { %s23_s21 = sadd.s32 1, %s2068_s21  }
 0x47c   : > { %p20_p4 = scmp.ge.s32.totalorder %s23_s21, 4  }
 0x47e   :  { %22 = sbr.rel (!%p20_p4) target bundleno = 1 (0x1), region = 180 }

// kernel: fast_multi_branch_forward.5
= control target key start
LH: loop header
LB: loop body
LE: loop exit
PB: predicated region body
PF: predicated region fallthrough
CT: control target
= control target key end

     0   :  { %s2098_s18 = smov 0   ;;  %s2270_s0 = inlined_call_operand.vmem [shape: f32[2,4,256], index: 0, kind: input, shape index: {}]   ;;  %s2271_s1 = inlined_call_operand.vmem [shape: f32[2,4,256], index: 1, kind: input, shape index: {}]   ;;  %s2272_s2 = inlined_call_operand.vmem [shape: f32[2,4,256], index: 2, kind: input, shape index: {}]   ;;  %s2273_s3 = inlined_call_operand.vmem [shape: f32[2,4,256], index: 3, kind: input, shape index: {}]   ;;  %s2274_s4 = inlined_call_operand.vmem [shape: f32[2,4,256], index: 4, kind: input, shape index: {}]   ;;  %s2275_s5 = inlined_call_operand.vmem [shape: f32[2,4,256], index: 5, kind: input, shape index: {}]   ;;  %s2276_s6 = inlined_call_operand.vmem [shape: f32[2,4,256], index: 6, kind: input, shape index: {}]   ;;  %s2277_s7 = inlined_call_operand.vmem [shape: f32[2,4,256], index: 7, kind: input, shape index: {}]   ;;  %s2278_s8 = inlined_call_operand.vmem [shape: f32[2,4,256], index: 8, kind: input, shape index: {}]   ;;  %s2279_s9 = inlined_call_operand.vmem [shape: f32[2,4,256], index: 9, kind: input, shape index: {}]   ;;  %s2280_s10 = inlined_call_operand.vmem [shape: f32[2,4,256], index: 10, kind: input, shape index: {}]   ;;  %s2281_s11 = inlined_call_operand.vmem [shape: f32[4,4], index: 11, kind: input, shape index: {}]   ;;  %s2282_s12 = inlined_call_operand.vmem [shape: f32[10,8,4], index: 12, kind: input, shape index: {}]   ;;  %s2283_s13 = inlined_call_operand.vmem [shape: f32[8,1], index: 13, kind: input, shape index: {}]   ;;  %s2284_s14 = inlined_call_operand.vmem [shape: f32[4,1], index: 14, kind: input, shape index: {}]   ;;  %s2285_s15 = inlined_call_operand.vmem [shape: f32[2,8,256], index: 15, kind: output, shape index: {}]  }
   0x1   :  { %2286 = sst [smem:[#allocation2_spill]] %s2270_s0 }
   0x2   :  { %2287 = sst [smem:[#allocation3_spill]] %s2271_s1 }
   0x3 LB: > { %s1860_s19 = sadd.s32 4294967295, %s2013_s18   ;;  %p1864_p0 = scmp.ge.s32.totalorder %s2013_s18, 1  ;;  %s2013_s18 = sphi %s2098_s18, %s25_s18  }
   0x4   : > { %p537_p1 = scmp.lt.s32.totalorder %s2013_s18, 3 }
   0x6   : > { %p538_p2 = pnand %p1864_p0, %p537_p1 }
   0x7   : > { %p635_p3 = scmp.lt.s32.totalorder (!%p538_p2), %s1860_s19, 1  ;;  %vm717_vm0 = vcmask (!%p538_p2), 1043456   ;;  %s2288_s1 = sld [smem:[#allocation3_spill]] (!%p538_p2)  ;;  %v706_v7 = vld [vmem:[%s2284_s14] sm:$0xf] (!%p538_p2)  ;;  %vm841_vm1 = vcmask (!%p538_p2), 31744   ;;  %v758_v35 = vlaneseq (!%p538_p2) }
   0x8   : > { %541 = sbr.rel (%p538_p2) target bundleno = 696 (0x2b8), region = 80  ;;  %v840_v8 = vld [vmem:[%s2282_s12] sm:$0xff] (!%p538_p2)  ;;  %1966 = vpush (!%p538_p2), %v706_v7  ;;  %v822_v9 = vrot.slane (!%p538_p2), %v706_v7, 1  ;;  %v828_v10 = vrot.slane (!%p538_p2), %v706_v7, 2  ;;  %v834_v11 = vrot.slane (!%p538_p2), %v706_v7, 3  ;;  %v2015_v12 = vmov (!%p538_p2), 0.0  }
   0x9   : > { %913 = vmatprep.mubr.f32.mxu1 (!%p538_p2), %v2015_v12  ;;  %1338 = vmatprep.mubr.f32.mxu0 (!%p538_p2), %v2015_v12  ;;  %s2289_s0 = sld [smem:[#allocation2_spill]] (!%p538_p2)  ;;  %v1896_v24 = vld [vmem:[%s2282_s12 + $0x8] sm:$0xff] (!%p538_p2)  ;;  %v1900_v29 = vld [vmem:[%s2282_s12 + $0x10] sm:$0xff] (!%p538_p2)  ;;  %v2190_v38 = vshrl.u32 (!%p538_p2), %v758_v35, 7  ;;  %v725_v44 = vld [vmem:[%s2281_s11] sm:$0xf] (!%p538_p2) }
   0xa   : > { %1968 = vpush (!%p538_p2), %v822_v9  ;;  %vm763_vm2 = vcmask (!%p538_p2), 27648   ;;  %v1904_v56 = vld [vmem:[%s2282_s12 + $0x18] sm:$0xff] (!%p538_p2)  ;;  %v1908_v63 = vld [vmem:[%s2282_s12 + $0x20] sm:$0xff] (!%p538_p2)  ;;  %v1916_v9 = vld [vmem:[%s2282_s12 + $0x30] sm:$0xff] (!%p538_p2) }
   0xb   : > { %1970 = vpush (!%p538_p2), %v828_v10  ;;  %v760_v41 = vsub.s32 (!%p538_p2), 0, %v2190_v38 }
   0xc   : > { %1972 = vpush (!%p538_p2), %v834_v11 }
   0xf   : > { %s2291_s19 = smov (!%p635_p3, %s1860_s19), 1 }
  0x10   : > { %s2109_s20 = sshll.u32 %s2291_s19, 3  ;;  %s1945_s27 = sshll.u32 %s2291_s19, 4 }
  0x11   : > { %s644_s23 = scalar_lea.vmem %s2288_s1, %s2109_s20  ;;  %s639_s30 = scalar_lea.vmem %s2289_s0, %s2109_s20 }
  0x12   : > { %v2115_v0 = vld [vmem:[%s644_s23] sm:$0xff]  ;;  %s679_s21 = scalar_lea.vmem %s2278_s8, %s2109_s20  ;;  %s659_s25 = scalar_lea.vmem %s2274_s4, %s2109_s20 }
  0x13   : > { %v715_v1 = vcombine.high %v2115_v0, %v2115_v0  ;;  %v2121_v2 = vsel %vm717_vm0, %v2115_v0, 0.0  ;;  %v2149_v13 = vld [vmem:[%s639_s30] sm:$0xff]  ;;  %s669_s1 = scalar_lea.vmem %s2276_s6, %s2109_s20  ;;  %s674_s0 = scalar_lea.vmem %s2277_s7, %s2109_s20  ;;  %v1889_v33 = vmul.f32 -1.442695, %v2115_v0 }
  0x14   : > { %v703_v14 = vld [vmem:[%s679_s21] sm:$0xff]  ;;  %s649_s21 = scalar_lea.vmem %s2272_s2, %s2109_s20  ;;  %v773_v31 = vrot.slane %v2121_v2, 4  ;;  %s654_s26 = scalar_lea.vmem %s2273_s3, %s2109_s20 }
  0x15   : > { %v2124_v3 = vsel %vm717_vm0, %v715_v1, 0.0  ;;  %1893 = vmatprep.subr.msk.mxu1 %vm717_vm0, %v715_v1  ;;  %v821_v15 = vmul.f32 %v703_v14, %v2149_v13  ;;  %v699_v17 = vld [vmem:[%s659_s25] sm:$0xff]  ;;  %1991 = vpow2.f32 %v1889_v33  ;;  %s664_s29 = scalar_lea.vmem %s2275_s5, %s2109_s20  ;;  %s689_s30 = scalar_lea.vmem %s2280_s10, %s2109_s20 }
  0x16   : > { %v720_v4 = vadd.f32 %v2124_v3, %v2121_v2  ;;  %1894 = vmatpush1.msk.msra.mxu1 %vm717_vm0, %v2115_v0  ;;  %v701_v19 = vld [vmem:[%s669_s1] sm:$0xff]  ;;  %v1014_v23 = vcombine.high %v699_v17, %v699_v17  ;;  %v779_v32 = vrot.slane %v2124_v3, 4  ;;  %v774_v34 = vadd.f32 %v773_v31, %v2121_v2 }
  0x17   : > { %1895 = vmatmul.mubr.msk.f32.vlgmr.msra.gmra.mrb[0].mxu1 %vm841_vm1, %v840_v8  ;;  %v702_v20 = vld [vmem:[%s674_s0] sm:$0xff]  ;;  %v2017_v31 = vmov 839922192  }
  0x18   : > { %721 = vadd.xlane.f32.xlu0 %v720_v4  ;;  %1002 = vmatprep.mubr.f32.mxu1 %v2015_v12  ;;  %v697_v21 = vld [vmem:[%s649_s21] sm:$0xff]  ;;  %v815_v25 = vmul.f32 %v702_v20, %v701_v19  ;;  %v780_v36 = vadd.f32 %v779_v32, %v2124_v3  ;;  %v775_v37 = vrot.slane %v774_v34, 2  ;;  %v802_v32 = vunpack.c.l.s4 %v2017_v31 }
  0x19   : > { %v1098_v26 = vcombine.high %v697_v21, %v697_v21  ;;  %v698_v10 = vld [vmem:[%s654_s26] sm:$0xff] }
  0x1a   : > { %v781_v39 = vrot.slane %v780_v36, 2  ;;  %v776_v40 = vadd.f32 %v775_v37, %v774_v34  ;;  %v700_v11 = vld [vmem:[%s664_s29] sm:$0xff]  ;;  %v803_v33 = vunpack.c.0.s8 %v802_v32 }
  0x1b   : > { %v705_v14 = vld [vmem:[%s689_s30] sm:$0xff] }
  0x1c   : > { %v782_v42 = vadd.f32 %v781_v39, %v780_v36  ;;  %v777_v45 = vrot.slane %v776_v40, 1 }
  0x1e   : > { %v783_v48 = vrot.slane %v782_v42, 1  ;;  %v778_v50 = vadd.f32 %v777_v45, %v776_v40  ;;  %v1928_v40 = vld [vmem:[%s2282_s12 + $0x48] sm:$0xff] }
  0x1f   : > { %v1992_v47 = vpop.eup %1991 }
  0x20   : > { %v710_v52 = vadd.f32 1.0, %v1992_v47  ;;  %v784_v53 = vadd.f32 %v783_v48, %v782_v42  ;;  %v1891_v54 = vmul.f32 -0.25, %v778_v50 }
  0x22   : > { %1993 = vrcp.f32 %v710_v52  ;;  %v1892_v55 = vmul.f32 -0.25, %v784_v53  ;;  %v790_v57 = vmul.f32 1.442695, %v1891_v54 }
  0x24   : > { %v792_v58 = vmul.f32 1.442695, %v1892_v55  ;;  %1995 = vpow2.f32 %v790_v57 }
  0x26   : > { %1997 = vpow2.f32 %v792_v58 }
  0x2c   : > { %v1994_v59 = vpop.eup %1993 }
  0x2d   : > { %v713_v60 = vmul.f32 %v1994_v59, %v2115_v0  ;;  %v1912_v0 = vld [vmem:[%s2282_s12 + $0x28] sm:$0xff] }
  0x2f   : > { %v1266_v62 = vcombine.high %v713_v60, %v713_v60 }
  0x31   : > { %1913 = vmatprep.subr.msk.mxu0 %vm717_vm0, %v1266_v62 }
  0x32   : > { %1914 = vmatpush1.msk.msra.mxu0 %vm717_vm0, %v713_v60 }
  0x33   : > { %1915 = vmatmul.mubr.msk.f32.vlgmr.msra.gmra.mrb[0].mxu0 %vm841_vm1, %v1912_v0 }
  0x34   : > { %1422 = vmatprep.mubr.f32.mxu0 %v2015_v12 }
  0x39   : > { %s1967_s22 = spop %1966 }
  0x3a   : > { %v818_v27 = vstv %s1967_s22 }
  0x3b   : > { %s1969_s16 = spop %1968  ;;  %v820_v28 = vadd.f32 %v818_v27, %v815_v25  ;;  %v839_v25 = vld [vmem:[%s2283_s13] sm:$0xff] }
  0x3c   : > { %v824_v16 = vstv %s1969_s16  ;;  %s684_s16 = scalar_lea.vmem %s2279_s9, %s2109_s20  ;;  %s1971_s21 = spop %1970 }
  0x3d   : > { %v826_v18 = vadd.f32 %v824_v16, %v821_v15  ;;  %v1182_v30 = vcombine.high %v820_v28, %v820_v28  ;;  %v704_v61 = vld [vmem:[%s684_s16] sm:$0xff]  ;;  %v830_v2 = vstv %s1971_s21  ;;  %s1973_s21 = spop %1972  ;;  %v1434_v15 = vcombine.high %v698_v10, %v698_v10  ;;  %s694_s16 = scalar_lea.vmem %s2285_s15, %s1945_s27 }
  0x3e   : > { %v827_v1 = vmul.f32 %v704_v61, %v2149_v13  ;;  %v833_v16 = vmul.f32 %v705_v14, %v700_v11 }
  0x3f   : > { %v930_v22 = vcombine.high %v826_v18, %v826_v18 }
  0x40   : > { %v832_v3 = vadd.f32 %v830_v2, %v827_v1 }
  0x41   : > { %1897 = vmatprep.subr.msk.mxu1 %vm717_vm0, %v930_v22 }
  0x42   : > { %1898 = vmatpush1.msk.msra.mxu1 %vm717_vm0, %v826_v18  ;;  %v1350_v4 = vcombine.high %v832_v3, %v832_v3  ;;  %v1920_v18 = vld [vmem:[%s2282_s12 + $0x38] sm:$0xff] }
  0x43   : > { %1899 = vmatmul.mubr.msk.f32.vlgmr.msra.gmra.mrb[0].mxu1 %vm841_vm1, %v1896_v24  ;;  %1901 = vmatprep.subr.msk.mxu1 %vm717_vm0, %v1014_v23  ;;  %v1924_v23 = vld [vmem:[%s2282_s12 + $0x40] sm:$0xff] }
  0x44   : > { %1902 = vmatpush1.msk.msra.mxu1 %vm717_vm0, %v699_v17  ;;  %1086 = vmatprep.mubr.f32.mxu1 %v2015_v12  ;;  %v836_v17 = vstv %s1973_s21 }
  0x45   : > { %1905 = vmatprep.subr.msk.mxu1 %vm717_vm0, %v1098_v26  ;;  %1917 = vmatprep.subr.msk.mxu0 %vm717_vm0, %v1350_v4  ;;  %v838_v19 = vadd.f32 %v836_v17, %v833_v16  ;;  %v2016_v26 = vmov 0  }
  0x46   : > { %1918 = vmatpush1.msk.msra.mxu0 %vm717_vm0, %v832_v3  ;;  %1985 = vset.pattern.permute.xlu1 %v2016_v26 }
  0x47   : > { %1919 = vmatmul.mubr.msk.f32.vlgmr.msra.gmra.mrb[0].mxu0 %vm841_vm1, %v1916_v9  ;;  %1921 = vmatprep.subr.msk.mxu0 %vm717_vm0, %v1434_v15  ;;  %v1518_v20 = vcombine.high %v838_v19, %v838_v19 }
  0x48   : > { %1506 = vmatprep.mubr.f32.mxu0 %v2015_v12  ;;  %1922 = vmatpush1.msk.msra.mxu0 %vm717_vm0, %v698_v10 }
  0x49   : > { %1925 = vmatprep.subr.msk.mxu0 %vm717_vm0, %v1518_v20 }
  0x4b   : > { %1903 = vmatmul.mubr.msk.f32.vlgmr.msra.gmra.mrb[0].mxu1 %vm841_vm1, %v1900_v29 }
  0x4c   : > { %1906 = vmatpush1.msk.msra.mxu1 %vm717_vm0, %v697_v21  ;;  %1170 = vmatprep.mubr.f32.mxu1 %v2015_v12 }
  0x4d   : > { %1909 = vmatprep.subr.msk.mxu1 %vm717_vm0, %v1182_v30 }
  0x4f   : > { %1923 = vmatmul.mubr.msk.f32.vlgmr.msra.gmra.mrb[0].mxu0 %vm841_vm1, %v1920_v18 }
  0x50   : > { %1590 = vmatprep.mubr.f32.mxu0 %v2015_v12  ;;  %1926 = vmatpush1.msk.msra.mxu0 %vm717_vm0, %v838_v19 }
  0x53   : > { %1907 = vmatmul.mubr.msk.f32.vlgmr.msra.gmra.mrb[0].mxu1 %vm841_vm1, %v1904_v56 }
  0x54   : > { %1910 = vmatpush1.msk.msra.mxu1 %vm717_vm0, %v820_v28  ;;  %1254 = vmatprep.mubr.f32.mxu1 %v2015_v12 }
  0x57   : > { %1927 = vmatmul.mubr.msk.f32.vlgmr.msra.gmra.mrb[0].mxu0 %vm841_vm1, %v1924_v23 }
  0x58   : > { %1674 = vmatprep.mubr.f32.mxu0 %v2015_v12  ;;  %v806_v12 = vsub.s32 %v803_v33, %v2190_v38 }
  0x5b   : > { %1911 = vmatmul.mubr.msk.f32.vlgmr.msra.gmra.mrb[0].mxu1 %vm841_vm1, %v1908_v63 }
  0xa5   : > { %v722_v5 = vpop.xlane.xlu0 %721 }
  0xa6   : > { %v724_v6 = vmul.f32 0.00390625, %v722_v5  ;;  %v1996_v5 = vpop.eup %1995 }
  0xa7   : > { %v794_v7 = vadd.f32 1.0, %v1996_v5 }
  0xa8   : > { %726 = vxpose.xlu0.b32.start.end [1/1] (short) (narrow) %v724_v6, 8  ;;  %v1998_v6 = vpop.eup %1997 }
  0xa9   : > { %v795_v8 = vadd.f32 1.0, %v1998_v6  ;;  %1999 = vrcp.f32 %v794_v7 }
  0xab   : > { %2001 = vrcp.f32 %v795_v8 }
  0xb3   : > { %v2000_v21 = vpop.eup %1999 }
  0xb5   : > { %v2002_v22 = vpop.eup %2001 }
  0xb6   : > { %v812_v24 = vcombine.low %v2000_v21, %v2002_v22 }
  0xd1   : > { %1986 = vset.pattern.permute.xlu0 %v2016_v26 }
 0x128   : > { %v742_v43 = vpop.trf.xlu0 }
 0x129   : > { %v761_v46 = vrot.slane %v742_v43, %v760_v41 }
 0x12b   : > { %v762_v49 = vmul.f32 %v761_v46, %v725_v44 }
 0x12d   : > { %v764_v51 = vsel %vm763_vm2, %v762_v49, 0.0 }
 0x12e   : > { %765 = vadd.xlane.f32.xlu1 %v764_v51  ;;  %v1256_v41 = vpop.f32.mrb[0].mxu1 }
 0x12f   : > { %v1258_v42 = vpop.f32.mrb[1].mxu1 }
 0x13f   : > { %922 = vperm.xlu1 %1985, %v839_v25  }
 0x1bb   : > { %v766_v27 = vpop.xlane.xlu1 %765 }
 0x1bc   : > { %v1890_v28 = vmul.f32 -1.442695, %v766_v27 }
 0x1be   : > { %2003 = vpow2.f32 %v1890_v28 }
 0x1bf   : > { %v923_v43 = vpop.permute.xlu1 %922 }
 0x1c0   : > { %v1946_v38 = vadd.f32 %v1256_v41, %v923_v43  ;;  %v1948_v44 = vadd.f32 %v1258_v42, %v923_v43 }
 0x1c8   : > { %v2004_v29 = vpop.eup %2003 }
 0x1c9   : > { %v770_v30 = vadd.f32 1.0, %v2004_v29 }
 0x1cb   : > { %2005 = vrcp.f32 %v770_v30 }
 0x1d5   : > { %v2006_v34 = vpop.eup %2005 }
 0x1d6   : > { %v807_v35 = vrot.slane %v2006_v34, %v806_v12 }
 0x1d8   : > { %v809_v36 = vmul.f32 %v807_v35, %v2149_v13 }
 0x1da   : > { %v814_v37 = vmul.f32 %v812_v24, %v809_v36 }
 0x1dc   : > { %v1602_v39 = vcombine.high %v814_v37, %v814_v37 }
 0x1de   : > { %1929 = vmatprep.subr.msk.mxu0 %vm717_vm0, %v1602_v39 }
 0x1df   : > { %1930 = vmatpush1.msk.msra.mxu0 %vm717_vm0, %v814_v37 }
 0x1e0   : > { %1931 = vmatmul.mubr.msk.f32.vlgmr.msra.gmra.mrb[0].mxu0 %vm841_vm1, %v1928_v40 }
 0x2b3   : > { %v1676_v13 = vpop.f32.mrb[0].mxu0 }
 0x2b4   : > { %v1947_v45 = vadd.f32 %v1946_v38, %v1676_v13  ;;  %v1678_v46 = vpop.f32.mrb[1].mxu0 }
 0x2b5   : > { %v1949_v47 = vadd.f32 %v1948_v44, %v1678_v46 }
 0x2b6   : > { %1683 = vst [vmem:[%s694_s16] sm:$0xff] %v1947_v45 }
 0x2b7   : > { %1684 = vst [vmem:[%s694_s16 + $0x8] sm:$0xff] %v1949_v47 }
 0x2b8 PF: > { %s25_s18 = sadd.s32 1, %s2013_s18  }
 0x2b9   : > { %p22_p4 = scmp.ge.s32.totalorder %s25_s18, 4  }
 0x2bb   :  { %24 = sbr.rel (!%p22_p4) target bundleno = 3 (0x3), region = 149 }

</bundles_post_ra>
